<compile_context>
chip_gen: v5e
topology: v5e:2x2
jax: 0.10.0
libtpu: 0.0.40
codegen_flags: <defaults>
</compile_context>

<pallas_src>
import jax
import jax.numpy as jnp
from jax.experimental import pallas as pl
from jax.experimental.pallas import tpu as pltpu


def _sigmoid(z):
    # logistic via tanh: a single EUP transcendental (no exp + full-precision divide).
    return 0.5 * (jnp.tanh(0.5 * z) + 1.0)


def _full_spec(shape):
    rank = len(shape)
    return pl.BlockSpec(shape, lambda *_args: (0,) * rank)


# ---------------- fully fused forward kernel ----------------
def _make_fused_kernel(B, S, Cout, H, num_layer):
    L1 = S - 2  # length after Conv1d(k=3, s=1); MaxPool1d(3,1,pad=1) preserves it.

    def kernel(x_ref, wc_ref, bc_ref, *rest):
        lstm_refs = rest[: 3 * num_layer]
        wlin_ref = rest[3 * num_layer]
        blin_ref = rest[3 * num_layer + 1]
        out_ref = rest[3 * num_layer + 2]

        bconv = bc_ref[...]                                   # (1, Cout)
        w0, w1, w2 = wc_ref[0], wc_ref[1], wc_ref[2]          # (Cin, Cout) per tap

        # ---- Conv1d(k=3, s=1) + ReLU + MaxPool1d(3, 1, pad=1), channels-last ----
        # B is tiny and static -> unrolled Python loop, everything stays in vregs.
        seq = []
        for b in range(B):
            xb = x_ref[b]                                      # (S, Cin)
            yb = (jnp.dot(xb[0:L1], w0, preferred_element_type=jnp.float32)
                  + jnp.dot(xb[1:L1 + 1], w1, preferred_element_type=jnp.float32)
                  + jnp.dot(xb[2:L1 + 2], w2, preferred_element_type=jnp.float32)
                  + bconv)
            yb = jnp.maximum(yb, 0.0)                          # ReLU (values >= 0)
            # MaxPool1d(3,1,padding=1): zero padding is equivalent to -inf pad post-ReLU.
            pad = jnp.zeros((1, Cout), jnp.float32)
            yp = jnp.concatenate([pad, yb, pad], axis=0)       # (L1 + 2, Cout)
            seq.append(jnp.maximum(jnp.maximum(yp[0:L1], yp[1:L1 + 1]), yp[2:L1 + 2]))

        # ---- LSTM stack: recurrence over T = B (batch_first=False quirk), N = L1 rows ----
        for layer in range(num_layer):
            wih_ref = lstm_refs[3 * layer]                     # (4, In, H)  gate-major
            whh_ref = lstm_refs[3 * layer + 1]                 # (4, H,  H)  gate-major
            bg_ref = lstm_refs[3 * layer + 2]                  # (4, 1,  H)  (b_ih + b_hh)
            wih = [wih_ref[g] for g in range(4)]
            whh = [whh_ref[g] for g in range(4)]
            bg = [bg_ref[g] for g in range(4)]

            h = jnp.zeros((L1, H), jnp.float32)
            c = jnp.zeros((L1, H), jnp.float32)
            outs = []
            for t in range(B):                                 # statically unrolled
                xt = seq[t]                                    # (N, In)

                def gate(g, xt=xt, h=h):
                    return (jnp.dot(xt, wih[g], preferred_element_type=jnp.float32)
                            + jnp.dot(h, whh[g], preferred_element_type=jnp.float32)
                            + bg[g])

                i_g = _sigmoid(gate(0))
                f_g = _sigmoid(gate(1))
                g_g = jnp.tanh(gate(2))
                o_g = _sigmoid(gate(3))
                c = f_g * c + i_g * g_g
                h = o_g * jnp.tanh(c)
                outs.append(h)
            seq = outs                                          # list of (N, H) per t

        # ---- self.linear(x)[:, -1, :]  (linear is pointwise => slice-then-matmul) ----
        last = jnp.concatenate([seq[t][L1 - 1:L1, :] for t in range(B)], axis=0)  # (B, H)
        out_ref[...] = (jnp.dot(last, wlin_ref[...], preferred_element_type=jnp.float32)
                        + blin_ref[...]).astype(out_ref.dtype)

    return kernel


def cnn_lstm_forward(x, params):
    B, S, _Cin = x.shape
    Cout = params["w_conv"].shape[-1]
    H = params["lstm"][0][1].shape[-1]
    num_layer = len(params["lstm"])
    O = params["w_lin"].shape[-1]

    kernel = _make_fused_kernel(B, S, Cout, H, num_layer)

    args = [x, params["w_conv"], params["b_conv"]]
    for (wih_g, whh_g, bg) in params["lstm"]:
        args += [wih_g, whh_g, bg]
    args += [params["w_lin"], params["b_lin"]]

    return pl.pallas_call(
        kernel,
        out_shape=jax.ShapeDtypeStruct((B, O), jnp.float32),
        grid=(1,),
        in_specs=[_full_spec(a.shape) for a in args],
        out_specs=_full_spec((B, O)),
        compiler_params=pltpu.CompilerParams(dimension_semantics=("arbitrary",)),
    )(*args)


# ---------------- deterministic parameter init (PyTorch-style uniform bounds) ----------------
def init_params(key, in_channels, out_channels, hidden_size, num_layer, output_size):
    ks = jax.random.split(key, 4 + 4 * num_layer)
    it = iter(range(len(ks)))

    def uni(k, shape, bound):
        return jax.random.uniform(k, shape, jnp.float32, -bound, bound)

    cb = 1.0 / float(jnp.sqrt(in_channels * 3.0))
    w_conv_pt = uni(ks[next(it)], (out_channels, in_channels, 3), cb)   # PyTorch (Cout, Cin, K)
    b_conv = uni(ks[next(it)], (out_channels,), cb)
    w_conv = jnp.transpose(w_conv_pt, (2, 1, 0))                        # (K, Cin, Cout)

    hb = 1.0 / float(jnp.sqrt(float(hidden_size)))
    lstm = []
    for layer in range(num_layer):
        in_l = out_channels if layer == 0 else hidden_size
        w_ih = uni(ks[next(it)], (4 * hidden_size, in_l), hb)           # PyTorch (4H, In)
        w_hh = uni(ks[next(it)], (4 * hidden_size, hidden_size), hb)    # PyTorch (4H, H)
        b_ih = uni(ks[next(it)], (4 * hidden_size,), hb)
        b_hh = uni(ks[next(it)], (4 * hidden_size,), hb)
        # gate-major (PyTorch gate order i, f, g, o), transposed for x @ W
        wih_g = jnp.transpose(w_ih.reshape(4, hidden_size, in_l), (0, 2, 1))         # (4, In, H)
        whh_g = jnp.transpose(w_hh.reshape(4, hidden_size, hidden_size), (0, 2, 1))  # (4, H, H)
        bg = (b_ih + b_hh).reshape(4, 1, hidden_size)                                # (4, 1, H)
        lstm.append((wih_g, whh_g, bg))

    w_lin_pt = uni(ks[next(it)], (output_size, hidden_size), hb)
    b_lin = uni(ks[next(it)], (output_size,), hb)

    return {
        "w_conv": w_conv,                              # (3, Cin, Cout)
        "b_conv": b_conv.reshape(1, out_channels),     # (1, Cout)
        "lstm": lstm,
        "w_lin": w_lin_pt.T,                           # (H, O)
        "b_lin": b_lin.reshape(1, output_size),        # (1, O)
    }


# ---------------- pure-JAX reference (same quirky semantics) for self-check ----------------
def reference_forward(x, params):
    B, S, _ = x.shape
    L1 = S - 2
    wc, bc = params["w_conv"], params["b_conv"]
    y = (x[:, 0:L1] @ wc[0] + x[:, 1:L1 + 1] @ wc[1] + x[:, 2:L1 + 2] @ wc[2] + bc)
    y = jnp.maximum(y, 0.0)
    yp = jnp.pad(y, ((0, 0), (1, 1), (0, 0)))
    seq = jnp.maximum(jnp.maximum(yp[:, 0:L1], yp[:, 1:L1 + 1]), yp[:, 2:L1 + 2])
    for (wih_g, whh_g, bg) in params["lstm"]:
        T, N, _ = seq.shape
        H = whh_g.shape[-1]
        h = jnp.zeros((N, H), jnp.float32)
        c = jnp.zeros((N, H), jnp.float32)
        outs = []
        for t in range(T):
            def sg(z):
                return 1.0 / (1.0 + jnp.exp(-z))
            zi = seq[t] @ wih_g[0] + h @ whh_g[0] + bg[0]
            zf = seq[t] @ wih_g[1] + h @ whh_g[1] + bg[1]
            zg = seq[t] @ wih_g[2] + h @ whh_g[2] + bg[2]
            zo = seq[t] @ wih_g[3] + h @ whh_g[3] + bg[3]
            c = sg(zf) * c + sg(zi) * jnp.tanh(zg)
            h = sg(zo) * jnp.tanh(c)
            outs.append(h)
        seq = jnp.stack(outs, axis=0)
    last = seq[:, -1, :]
    return last @ params["w_lin"] + params["b_lin"]


if __name__ == "__main__":
    B, S = 2, 16
    in_channels, out_channels = 4, 8
    hidden_size, num_layer, output_size = 32, 2, 10

    key = jax.random.PRNGKey(0)
    kx, kp = jax.random.split(key)
    x = jax.random.normal(kx, (B, S, in_channels), jnp.float32)
    params = init_params(kp, in_channels, out_channels, hidden_size, num_layer, output_size)

    out = jax.block_until_ready(cnn_lstm_forward(x, params))
    ref = reference_forward(x, params)

    assert out.shape == (B, output_size), out.shape
    assert jnp.allclose(out, ref, atol=1e-4, rtol=1e-4), (out, ref)
    print("KERNEL_OK")
</pallas_src>

<mosaic_0001>
module attributes {stable_mosaic.version = 11 : i64} {
  func.func @kernel(%arg0: i32, %arg1: memref<2x16x4xf32, #tpu.memory_space<vmem>>, %arg2: memref<3x4x8xf32, #tpu.memory_space<vmem>>, %arg3: memref<1x8xf32, #tpu.memory_space<vmem>>, %arg4: memref<4x8x32xf32, #tpu.memory_space<vmem>>, %arg5: memref<4x32x32xf32, #tpu.memory_space<vmem>>, %arg6: memref<4x1x32xf32, #tpu.memory_space<vmem>>, %arg7: memref<4x32x32xf32, #tpu.memory_space<vmem>>, %arg8: memref<4x32x32xf32, #tpu.memory_space<vmem>>, %arg9: memref<4x1x32xf32, #tpu.memory_space<vmem>>, %arg10: memref<32x10xf32, #tpu.memory_space<vmem>>, %arg11: memref<1x10xf32, #tpu.memory_space<vmem>>, %arg12: memref<2x10xf32, #tpu.memory_space<vmem>>) attributes {dimension_semantics = [#tpu.dimension_semantics<arbitrary>], iteration_bounds = array<i64: 1>, scalar_prefetch = 0 : i64, scratch_operands = 0 : i64, tpu.core_type = #tpu.core_type<tc>, window_params = [{pipeline_mode = #tpu.pipeline_mode<synchronous>, transform_indices = @transform_0, window_bounds = array<i64: 2, 16, 4>}, {pipeline_mode = #tpu.pipeline_mode<synchronous>, transform_indices = @transform_1, window_bounds = array<i64: 3, 4, 8>}, {pipeline_mode = #tpu.pipeline_mode<synchronous>, transform_indices = @transform_2, window_bounds = array<i64: 1, 8>}, {pipeline_mode = #tpu.pipeline_mode<synchronous>, transform_indices = @transform_3, window_bounds = array<i64: 4, 8, 32>}, {pipeline_mode = #tpu.pipeline_mode<synchronous>, transform_indices = @transform_4, window_bounds = array<i64: 4, 32, 32>}, {pipeline_mode = #tpu.pipeline_mode<synchronous>, transform_indices = @transform_5, window_bounds = array<i64: 4, 1, 32>}, {pipeline_mode = #tpu.pipeline_mode<synchronous>, transform_indices = @transform_6, window_bounds = array<i64: 4, 32, 32>}, {pipeline_mode = #tpu.pipeline_mode<synchronous>, transform_indices = @transform_7, window_bounds = array<i64: 4, 32, 32>}, {pipeline_mode = #tpu.pipeline_mode<synchronous>, transform_indices = @transform_8, window_bounds = array<i64: 4, 1, 32>}, {pipeline_mode = #tpu.pipeline_mode<synchronous>, transform_indices = @transform_9, window_bounds = array<i64: 32, 10>}, {pipeline_mode = #tpu.pipeline_mode<synchronous>, transform_indices = @transform_10, window_bounds = array<i64: 1, 10>}, {pipeline_mode = #tpu.pipeline_mode<synchronous>, transform_indices = @transform_11, window_bounds = array<i64: 2, 10>}]} {
    %c0 = arith.constant 0 : index
    %c0_0 = arith.constant 0 : index
    %0 = vector.load %arg3[%c0, %c0_0] : memref<1x8xf32, #tpu.memory_space<vmem>>, vector<1x8xf32>
    %c0_1 = arith.constant 0 : index
    %c0_2 = arith.constant 0 : index
    %c0_3 = arith.constant 0 : index
    %1 = vector.load %arg2[%c0_1, %c0_2, %c0_3] : memref<3x4x8xf32, #tpu.memory_space<vmem>>, vector<1x4x8xf32>
    %2 = vector.shape_cast %1 : vector<1x4x8xf32> to vector<4x8xf32>
    %c1 = arith.constant 1 : index
    %c0_4 = arith.constant 0 : index
    %c0_5 = arith.constant 0 : index
    %3 = vector.load %arg2[%c1, %c0_4, %c0_5] : memref<3x4x8xf32, #tpu.memory_space<vmem>>, vector<1x4x8xf32>
    %4 = vector.shape_cast %3 : vector<1x4x8xf32> to vector<4x8xf32>
    %c2 = arith.constant 2 : index
    %c0_6 = arith.constant 0 : index
    %c0_7 = arith.constant 0 : index
    %5 = vector.load %arg2[%c2, %c0_6, %c0_7] : memref<3x4x8xf32, #tpu.memory_space<vmem>>, vector<1x4x8xf32>
    %6 = vector.shape_cast %5 : vector<1x4x8xf32> to vector<4x8xf32>
    %c0_8 = arith.constant 0 : index
    %c0_9 = arith.constant 0 : index
    %c0_10 = arith.constant 0 : index
    %7 = vector.load %arg1[%c0_8, %c0_9, %c0_10] : memref<2x16x4xf32, #tpu.memory_space<vmem>>, vector<1x16x4xf32>
    %8 = vector.shape_cast %7 : vector<1x16x4xf32> to vector<16x4xf32>
    %9 = vector.extract_strided_slice %8 {offsets = [0, 0], sizes = [14, 4], strides = [1, 1]} : vector<16x4xf32> to vector<14x4xf32>
    %cst = arith.constant dense<0.000000e+00> : vector<14x8xf32>
    %10 = tpu.matmul %9, %2, %cst {dimension_numbers = #tpu.dot_dimension_numbers<[1], [0], [0], [1], [0, 0, 1, 1], [], []>} : vector<14x4xf32>, vector<4x8xf32>, vector<14x8xf32> -> vector<14x8xf32>
    %11 = vector.extract_strided_slice %8 {offsets = [1, 0], sizes = [14, 4], strides = [1, 1]} : vector<16x4xf32> to vector<14x4xf32>
    %cst_11 = arith.constant dense<0.000000e+00> : vector<14x8xf32>
    %12 = tpu.matmul %11, %4, %cst_11 {dimension_numbers = #tpu.dot_dimension_numbers<[1], [0], [0], [1], [0, 0, 1, 1], [], []>} : vector<14x4xf32>, vector<4x8xf32>, vector<14x8xf32> -> vector<14x8xf32>
    %13 = arith.addf %10, %12 : vector<14x8xf32>
    %14 = vector.extract_strided_slice %8 {offsets = [2, 0], sizes = [14, 4], strides = [1, 1]} : vector<16x4xf32> to vector<14x4xf32>
    %cst_12 = arith.constant dense<0.000000e+00> : vector<14x8xf32>
    %15 = tpu.matmul %14, %6, %cst_12 {dimension_numbers = #tpu.dot_dimension_numbers<[1], [0], [0], [1], [0, 0, 1, 1], [], []>} : vector<14x4xf32>, vector<4x8xf32>, vector<14x8xf32> -> vector<14x8xf32>
    %16 = arith.addf %13, %15 : vector<14x8xf32>
    %17 = vector.broadcast %0 : vector<1x8xf32> to vector<14x8xf32>
    %18 = arith.addf %16, %17 : vector<14x8xf32>
    %cst_13 = arith.constant 0.000000e+00 : f32
    %19 = vector.broadcast %cst_13 : f32 to vector<14x8xf32>
    %20 = arith.maximumf %18, %19 : vector<14x8xf32>
    %cst_14 = arith.constant 0.000000e+00 : f32
    %21 = vector.broadcast %cst_14 : f32 to vector<1x8xf32>
    %22 = tpu.concatenate %21, %20, %21 in 0 : vector<1x8xf32>, vector<14x8xf32>, vector<1x8xf32> -> vector<16x8xf32>
    %23 = vector.extract_strided_slice %22 {offsets = [0, 0], sizes = [14, 8], strides = [1, 1]} : vector<16x8xf32> to vector<14x8xf32>
    %24 = vector.extract_strided_slice %22 {offsets = [1, 0], sizes = [14, 8], strides = [1, 1]} : vector<16x8xf32> to vector<14x8xf32>
    %25 = arith.maximumf %23, %24 : vector<14x8xf32>
    %26 = vector.extract_strided_slice %22 {offsets = [2, 0], sizes = [14, 8], strides = [1, 1]} : vector<16x8xf32> to vector<14x8xf32>
    %27 = arith.maximumf %25, %26 : vector<14x8xf32>
    %c1_15 = arith.constant 1 : index
    %c0_16 = arith.constant 0 : index
    %c0_17 = arith.constant 0 : index
    %28 = vector.load %arg1[%c1_15, %c0_16, %c0_17] : memref<2x16x4xf32, #tpu.memory_space<vmem>>, vector<1x16x4xf32>
    %29 = vector.shape_cast %28 : vector<1x16x4xf32> to vector<16x4xf32>
    %30 = vector.extract_strided_slice %29 {offsets = [0, 0], sizes = [14, 4], strides = [1, 1]} : vector<16x4xf32> to vector<14x4xf32>
    %cst_18 = arith.constant dense<0.000000e+00> : vector<14x8xf32>
    %31 = tpu.matmul %30, %2, %cst_18 {dimension_numbers = #tpu.dot_dimension_numbers<[1], [0], [0], [1], [0, 0, 1, 1], [], []>} : vector<14x4xf32>, vector<4x8xf32>, vector<14x8xf32> -> vector<14x8xf32>
    %32 = vector.extract_strided_slice %29 {offsets = [1, 0], sizes = [14, 4], strides = [1, 1]} : vector<16x4xf32> to vector<14x4xf32>
    %cst_19 = arith.constant dense<0.000000e+00> : vector<14x8xf32>
    %33 = tpu.matmul %32, %4, %cst_19 {dimension_numbers = #tpu.dot_dimension_numbers<[1], [0], [0], [1], [0, 0, 1, 1], [], []>} : vector<14x4xf32>, vector<4x8xf32>, vector<14x8xf32> -> vector<14x8xf32>
    %34 = arith.addf %31, %33 : vector<14x8xf32>
    %35 = vector.extract_strided_slice %29 {offsets = [2, 0], sizes = [14, 4], strides = [1, 1]} : vector<16x4xf32> to vector<14x4xf32>
    %cst_20 = arith.constant dense<0.000000e+00> : vector<14x8xf32>
    %36 = tpu.matmul %35, %6, %cst_20 {dimension_numbers = #tpu.dot_dimension_numbers<[1], [0], [0], [1], [0, 0, 1, 1], [], []>} : vector<14x4xf32>, vector<4x8xf32>, vector<14x8xf32> -> vector<14x8xf32>
    %37 = arith.addf %34, %36 : vector<14x8xf32>
    %38 = vector.broadcast %0 : vector<1x8xf32> to vector<14x8xf32>
    %39 = arith.addf %37, %38 : vector<14x8xf32>
    %cst_21 = arith.constant 0.000000e+00 : f32
    %40 = vector.broadcast %cst_21 : f32 to vector<14x8xf32>
    %41 = arith.maximumf %39, %40 : vector<14x8xf32>
    %cst_22 = arith.constant 0.000000e+00 : f32
    %42 = vector.broadcast %cst_22 : f32 to vector<1x8xf32>
    %43 = tpu.concatenate %42, %41, %42 in 0 : vector<1x8xf32>, vector<14x8xf32>, vector<1x8xf32> -> vector<16x8xf32>
    %44 = vector.extract_strided_slice %43 {offsets = [0, 0], sizes = [14, 8], strides = [1, 1]} : vector<16x8xf32> to vector<14x8xf32>
    %45 = vector.extract_strided_slice %43 {offsets = [1, 0], sizes = [14, 8], strides = [1, 1]} : vector<16x8xf32> to vector<14x8xf32>
    %46 = arith.maximumf %44, %45 : vector<14x8xf32>
    %47 = vector.extract_strided_slice %43 {offsets = [2, 0], sizes = [14, 8], strides = [1, 1]} : vector<16x8xf32> to vector<14x8xf32>
    %48 = arith.maximumf %46, %47 : vector<14x8xf32>
    %c0_23 = arith.constant 0 : index
    %c0_24 = arith.constant 0 : index
    %c0_25 = arith.constant 0 : index
    %49 = vector.load %arg4[%c0_23, %c0_24, %c0_25] : memref<4x8x32xf32, #tpu.memory_space<vmem>>, vector<1x8x32xf32>
    %50 = vector.shape_cast %49 : vector<1x8x32xf32> to vector<8x32xf32>
    %c1_26 = arith.constant 1 : index
    %c0_27 = arith.constant 0 : index
    %c0_28 = arith.constant 0 : index
    %51 = vector.load %arg4[%c1_26, %c0_27, %c0_28] : memref<4x8x32xf32, #tpu.memory_space<vmem>>, vector<1x8x32xf32>
    %52 = vector.shape_cast %51 : vector<1x8x32xf32> to vector<8x32xf32>
    %c2_29 = arith.constant 2 : index
    %c0_30 = arith.constant 0 : index
    %c0_31 = arith.constant 0 : index
    %53 = vector.load %arg4[%c2_29, %c0_30, %c0_31] : memref<4x8x32xf32, #tpu.memory_space<vmem>>, vector<1x8x32xf32>
    %54 = vector.shape_cast %53 : vector<1x8x32xf32> to vector<8x32xf32>
    %c3 = arith.constant 3 : index
    %c0_32 = arith.constant 0 : index
    %c0_33 = arith.constant 0 : index
    %55 = vector.load %arg4[%c3, %c0_32, %c0_33] : memref<4x8x32xf32, #tpu.memory_space<vmem>>, vector<1x8x32xf32>
    %56 = vector.shape_cast %55 : vector<1x8x32xf32> to vector<8x32xf32>
    %c0_34 = arith.constant 0 : index
    %c0_35 = arith.constant 0 : index
    %c0_36 = arith.constant 0 : index
    %57 = vector.load %arg5[%c0_34, %c0_35, %c0_36] : memref<4x32x32xf32, #tpu.memory_space<vmem>>, vector<1x32x32xf32>
    %58 = vector.shape_cast %57 : vector<1x32x32xf32> to vector<32x32xf32>
    %c1_37 = arith.constant 1 : index
    %c0_38 = arith.constant 0 : index
    %c0_39 = arith.constant 0 : index
    %59 = vector.load %arg5[%c1_37, %c0_38, %c0_39] : memref<4x32x32xf32, #tpu.memory_space<vmem>>, vector<1x32x32xf32>
    %60 = vector.shape_cast %59 : vector<1x32x32xf32> to vector<32x32xf32>
    %c2_40 = arith.constant 2 : index
    %c0_41 = arith.constant 0 : index
    %c0_42 = arith.constant 0 : index
    %61 = vector.load %arg5[%c2_40, %c0_41, %c0_42] : memref<4x32x32xf32, #tpu.memory_space<vmem>>, vector<1x32x32xf32>
    %62 = vector.shape_cast %61 : vector<1x32x32xf32> to vector<32x32xf32>
    %c3_43 = arith.constant 3 : index
    %c0_44 = arith.constant 0 : index
    %c0_45 = arith.constant 0 : index
    %63 = vector.load %arg5[%c3_43, %c0_44, %c0_45] : memref<4x32x32xf32, #tpu.memory_space<vmem>>, vector<1x32x32xf32>
    %64 = vector.shape_cast %63 : vector<1x32x32xf32> to vector<32x32xf32>
    %c0_46 = arith.constant 0 : index
    %c0_47 = arith.constant 0 : index
    %c0_48 = arith.constant 0 : index
    %65 = vector.load %arg6[%c0_46, %c0_47, %c0_48] : memref<4x1x32xf32, #tpu.memory_space<vmem>>, vector<1x1x32xf32>
    %66 = vector.shape_cast %65 : vector<1x1x32xf32> to vector<1x32xf32>
    %c1_49 = arith.constant 1 : index
    %c0_50 = arith.constant 0 : index
    %c0_51 = arith.constant 0 : index
    %67 = vector.load %arg6[%c1_49, %c0_50, %c0_51] : memref<4x1x32xf32, #tpu.memory_space<vmem>>, vector<1x1x32xf32>
    %68 = vector.shape_cast %67 : vector<1x1x32xf32> to vector<1x32xf32>
    %c2_52 = arith.constant 2 : index
    %c0_53 = arith.constant 0 : index
    %c0_54 = arith.constant 0 : index
    %69 = vector.load %arg6[%c2_52, %c0_53, %c0_54] : memref<4x1x32xf32, #tpu.memory_space<vmem>>, vector<1x1x32xf32>
    %70 = vector.shape_cast %69 : vector<1x1x32xf32> to vector<1x32xf32>
    %c3_55 = arith.constant 3 : index
    %c0_56 = arith.constant 0 : index
    %c0_57 = arith.constant 0 : index
    %71 = vector.load %arg6[%c3_55, %c0_56, %c0_57] : memref<4x1x32xf32, #tpu.memory_space<vmem>>, vector<1x1x32xf32>
    %72 = vector.shape_cast %71 : vector<1x1x32xf32> to vector<1x32xf32>
    %cst_58 = arith.constant 0.000000e+00 : f32
    %73 = vector.broadcast %cst_58 : f32 to vector<14x32xf32>
    %cst_59 = arith.constant 0.000000e+00 : f32
    %74 = vector.broadcast %cst_59 : f32 to vector<14x32xf32>
    %cst_60 = arith.constant dense<0.000000e+00> : vector<14x32xf32>
    %75 = tpu.matmul %27, %50, %cst_60 {dimension_numbers = #tpu.dot_dimension_numbers<[1], [0], [0], [1], [0, 0, 1, 1], [], []>} : vector<14x8xf32>, vector<8x32xf32>, vector<14x32xf32> -> vector<14x32xf32>
    %cst_61 = arith.constant dense<0.000000e+00> : vector<14x32xf32>
    %76 = tpu.matmul %73, %58, %cst_61 {dimension_numbers = #tpu.dot_dimension_numbers<[1], [0], [0], [1], [0, 0, 1, 1], [], []>} : vector<14x32xf32>, vector<32x32xf32>, vector<14x32xf32> -> vector<14x32xf32>
    %77 = arith.addf %75, %76 : vector<14x32xf32>
    %78 = vector.broadcast %66 : vector<1x32xf32> to vector<14x32xf32>
    %79 = arith.addf %77, %78 : vector<14x32xf32>
    %cst_62 = arith.constant 5.000000e-01 : f32
    %80 = vector.broadcast %cst_62 : f32 to vector<14x32xf32>
    %81 = arith.mulf %80, %79 : vector<14x32xf32>
    %82 = math.tanh %81 : vector<14x32xf32>
    %cst_63 = arith.constant 1.000000e+00 : f32
    %83 = vector.broadcast %cst_63 : f32 to vector<14x32xf32>
    %84 = arith.addf %82, %83 : vector<14x32xf32>
    %cst_64 = arith.constant 5.000000e-01 : f32
    %85 = vector.broadcast %cst_64 : f32 to vector<14x32xf32>
    %86 = arith.mulf %85, %84 : vector<14x32xf32>
    %cst_65 = arith.constant dense<0.000000e+00> : vector<14x32xf32>
    %87 = tpu.matmul %27, %52, %cst_65 {dimension_numbers = #tpu.dot_dimension_numbers<[1], [0], [0], [1], [0, 0, 1, 1], [], []>} : vector<14x8xf32>, vector<8x32xf32>, vector<14x32xf32> -> vector<14x32xf32>
    %cst_66 = arith.constant dense<0.000000e+00> : vector<14x32xf32>
    %88 = tpu.matmul %73, %60, %cst_66 {dimension_numbers = #tpu.dot_dimension_numbers<[1], [0], [0], [1], [0, 0, 1, 1], [], []>} : vector<14x32xf32>, vector<32x32xf32>, vector<14x32xf32> -> vector<14x32xf32>
    %89 = arith.addf %87, %88 : vector<14x32xf32>
    %90 = vector.broadcast %68 : vector<1x32xf32> to vector<14x32xf32>
    %91 = arith.addf %89, %90 : vector<14x32xf32>
    %cst_67 = arith.constant 5.000000e-01 : f32
    %92 = vector.broadcast %cst_67 : f32 to vector<14x32xf32>
    %93 = arith.mulf %92, %91 : vector<14x32xf32>
    %94 = math.tanh %93 : vector<14x32xf32>
    %cst_68 = arith.constant 1.000000e+00 : f32
    %95 = vector.broadcast %cst_68 : f32 to vector<14x32xf32>
    %96 = arith.addf %94, %95 : vector<14x32xf32>
    %cst_69 = arith.constant 5.000000e-01 : f32
    %97 = vector.broadcast %cst_69 : f32 to vector<14x32xf32>
    %98 = arith.mulf %97, %96 : vector<14x32xf32>
    %cst_70 = arith.constant dense<0.000000e+00> : vector<14x32xf32>
    %99 = tpu.matmul %27, %54, %cst_70 {dimension_numbers = #tpu.dot_dimension_numbers<[1], [0], [0], [1], [0, 0, 1, 1], [], []>} : vector<14x8xf32>, vector<8x32xf32>, vector<14x32xf32> -> vector<14x32xf32>
    %cst_71 = arith.constant dense<0.000000e+00> : vector<14x32xf32>
    %100 = tpu.matmul %73, %62, %cst_71 {dimension_numbers = #tpu.dot_dimension_numbers<[1], [0], [0], [1], [0, 0, 1, 1], [], []>} : vector<14x32xf32>, vector<32x32xf32>, vector<14x32xf32> -> vector<14x32xf32>
    %101 = arith.addf %99, %100 : vector<14x32xf32>
    %102 = vector.broadcast %70 : vector<1x32xf32> to vector<14x32xf32>
    %103 = arith.addf %101, %102 : vector<14x32xf32>
    %104 = math.tanh %103 : vector<14x32xf32>
    %cst_72 = arith.constant dense<0.000000e+00> : vector<14x32xf32>
    %105 = tpu.matmul %27, %56, %cst_72 {dimension_numbers = #tpu.dot_dimension_numbers<[1], [0], [0], [1], [0, 0, 1, 1], [], []>} : vector<14x8xf32>, vector<8x32xf32>, vector<14x32xf32> -> vector<14x32xf32>
    %cst_73 = arith.constant dense<0.000000e+00> : vector<14x32xf32>
    %106 = tpu.matmul %73, %64, %cst_73 {dimension_numbers = #tpu.dot_dimension_numbers<[1], [0], [0], [1], [0, 0, 1, 1], [], []>} : vector<14x32xf32>, vector<32x32xf32>, vector<14x32xf32> -> vector<14x32xf32>
    %107 = arith.addf %105, %106 : vector<14x32xf32>
    %108 = vector.broadcast %72 : vector<1x32xf32> to vector<14x32xf32>
    %109 = arith.addf %107, %108 : vector<14x32xf32>
    %cst_74 = arith.constant 5.000000e-01 : f32
    %110 = vector.broadcast %cst_74 : f32 to vector<14x32xf32>
    %111 = arith.mulf %110, %109 : vector<14x32xf32>
    %112 = math.tanh %111 : vector<14x32xf32>
    %cst_75 = arith.constant 1.000000e+00 : f32
    %113 = vector.broadcast %cst_75 : f32 to vector<14x32xf32>
    %114 = arith.addf %112, %113 : vector<14x32xf32>
    %cst_76 = arith.constant 5.000000e-01 : f32
    %115 = vector.broadcast %cst_76 : f32 to vector<14x32xf32>
    %116 = arith.mulf %115, %114 : vector<14x32xf32>
    %117 = arith.mulf %98, %74 : vector<14x32xf32>
    %118 = arith.mulf %86, %104 : vector<14x32xf32>
    %119 = arith.addf %117, %118 : vector<14x32xf32>
    %120 = math.tanh %119 : vector<14x32xf32>
    %121 = arith.mulf %116, %120 : vector<14x32xf32>
    %cst_77 = arith.constant dense<0.000000e+00> : vector<14x32xf32>
    %122 = tpu.matmul %48, %50, %cst_77 {dimension_numbers = #tpu.dot_dimension_numbers<[1], [0], [0], [1], [0, 0, 1, 1], [], []>} : vector<14x8xf32>, vector<8x32xf32>, vector<14x32xf32> -> vector<14x32xf32>
    %cst_78 = arith.constant dense<0.000000e+00> : vector<14x32xf32>
    %123 = tpu.matmul %121, %58, %cst_78 {dimension_numbers = #tpu.dot_dimension_numbers<[1], [0], [0], [1], [0, 0, 1, 1], [], []>} : vector<14x32xf32>, vector<32x32xf32>, vector<14x32xf32> -> vector<14x32xf32>
    %124 = arith.addf %122, %123 : vector<14x32xf32>
    %125 = vector.broadcast %66 : vector<1x32xf32> to vector<14x32xf32>
    %126 = arith.addf %124, %125 : vector<14x32xf32>
    %cst_79 = arith.constant 5.000000e-01 : f32
    %127 = vector.broadcast %cst_79 : f32 to vector<14x32xf32>
    %128 = arith.mulf %127, %126 : vector<14x32xf32>
    %129 = math.tanh %128 : vector<14x32xf32>
    %cst_80 = arith.constant 1.000000e+00 : f32
    %130 = vector.broadcast %cst_80 : f32 to vector<14x32xf32>
    %131 = arith.addf %129, %130 : vector<14x32xf32>
    %cst_81 = arith.constant 5.000000e-01 : f32
    %132 = vector.broadcast %cst_81 : f32 to vector<14x32xf32>
    %133 = arith.mulf %132, %131 : vector<14x32xf32>
    %cst_82 = arith.constant dense<0.000000e+00> : vector<14x32xf32>
    %134 = tpu.matmul %48, %52, %cst_82 {dimension_numbers = #tpu.dot_dimension_numbers<[1], [0], [0], [1], [0, 0, 1, 1], [], []>} : vector<14x8xf32>, vector<8x32xf32>, vector<14x32xf32> -> vector<14x32xf32>
    %cst_83 = arith.constant dense<0.000000e+00> : vector<14x32xf32>
    %135 = tpu.matmul %121, %60, %cst_83 {dimension_numbers = #tpu.dot_dimension_numbers<[1], [0], [0], [1], [0, 0, 1, 1], [], []>} : vector<14x32xf32>, vector<32x32xf32>, vector<14x32xf32> -> vector<14x32xf32>
    %136 = arith.addf %134, %135 : vector<14x32xf32>
    %137 = vector.broadcast %68 : vector<1x32xf32> to vector<14x32xf32>
    %138 = arith.addf %136, %137 : vector<14x32xf32>
    %cst_84 = arith.constant 5.000000e-01 : f32
    %139 = vector.broadcast %cst_84 : f32 to vector<14x32xf32>
    %140 = arith.mulf %139, %138 : vector<14x32xf32>
    %141 = math.tanh %140 : vector<14x32xf32>
    %cst_85 = arith.constant 1.000000e+00 : f32
    %142 = vector.broadcast %cst_85 : f32 to vector<14x32xf32>
    %143 = arith.addf %141, %142 : vector<14x32xf32>
    %cst_86 = arith.constant 5.000000e-01 : f32
    %144 = vector.broadcast %cst_86 : f32 to vector<14x32xf32>
    %145 = arith.mulf %144, %143 : vector<14x32xf32>
    %cst_87 = arith.constant dense<0.000000e+00> : vector<14x32xf32>
    %146 = tpu.matmul %48, %54, %cst_87 {dimension_numbers = #tpu.dot_dimension_numbers<[1], [0], [0], [1], [0, 0, 1, 1], [], []>} : vector<14x8xf32>, vector<8x32xf32>, vector<14x32xf32> -> vector<14x32xf32>
    %cst_88 = arith.constant dense<0.000000e+00> : vector<14x32xf32>
    %147 = tpu.matmul %121, %62, %cst_88 {dimension_numbers = #tpu.dot_dimension_numbers<[1], [0], [0], [1], [0, 0, 1, 1], [], []>} : vector<14x32xf32>, vector<32x32xf32>, vector<14x32xf32> -> vector<14x32xf32>
    %148 = arith.addf %146, %147 : vector<14x32xf32>
    %149 = vector.broadcast %70 : vector<1x32xf32> to vector<14x32xf32>
    %150 = arith.addf %148, %149 : vector<14x32xf32>
    %151 = math.tanh %150 : vector<14x32xf32>
    %cst_89 = arith.constant dense<0.000000e+00> : vector<14x32xf32>
    %152 = tpu.matmul %48, %56, %cst_89 {dimension_numbers = #tpu.dot_dimension_numbers<[1], [0], [0], [1], [0, 0, 1, 1], [], []>} : vector<14x8xf32>, vector<8x32xf32>, vector<14x32xf32> -> vector<14x32xf32>
    %cst_90 = arith.constant dense<0.000000e+00> : vector<14x32xf32>
    %153 = tpu.matmul %121, %64, %cst_90 {dimension_numbers = #tpu.dot_dimension_numbers<[1], [0], [0], [1], [0, 0, 1, 1], [], []>} : vector<14x32xf32>, vector<32x32xf32>, vector<14x32xf32> -> vector<14x32xf32>
    %154 = arith.addf %152, %153 : vector<14x32xf32>
    %155 = vector.broadcast %72 : vector<1x32xf32> to vector<14x32xf32>
    %156 = arith.addf %154, %155 : vector<14x32xf32>
    %cst_91 = arith.constant 5.000000e-01 : f32
    %157 = vector.broadcast %cst_91 : f32 to vector<14x32xf32>
    %158 = arith.mulf %157, %156 : vector<14x32xf32>
    %159 = math.tanh %158 : vector<14x32xf32>
    %cst_92 = arith.constant 1.000000e+00 : f32
    %160 = vector.broadcast %cst_92 : f32 to vector<14x32xf32>
    %161 = arith.addf %159, %160 : vector<14x32xf32>
    %cst_93 = arith.constant 5.000000e-01 : f32
    %162 = vector.broadcast %cst_93 : f32 to vector<14x32xf32>
    %163 = arith.mulf %162, %161 : vector<14x32xf32>
    %164 = arith.mulf %145, %119 : vector<14x32xf32>
    %165 = arith.mulf %133, %151 : vector<14x32xf32>
    %166 = arith.addf %164, %165 : vector<14x32xf32>
    %167 = math.tanh %166 : vector<14x32xf32>
    %168 = arith.mulf %163, %167 : vector<14x32xf32>
    %c0_94 = arith.constant 0 : index
    %c0_95 = arith.constant 0 : index
    %c0_96 = arith.constant 0 : index
    %169 = vector.load %arg7[%c0_94, %c0_95, %c0_96] : memref<4x32x32xf32, #tpu.memory_space<vmem>>, vector<1x32x32xf32>
    %170 = vector.shape_cast %169 : vector<1x32x32xf32> to vector<32x32xf32>
    %c1_97 = arith.constant 1 : index
    %c0_98 = arith.constant 0 : index
    %c0_99 = arith.constant 0 : index
    %171 = vector.load %arg7[%c1_97, %c0_98, %c0_99] : memref<4x32x32xf32, #tpu.memory_space<vmem>>, vector<1x32x32xf32>
    %172 = vector.shape_cast %171 : vector<1x32x32xf32> to vector<32x32xf32>
    %c2_100 = arith.constant 2 : index
    %c0_101 = arith.constant 0 : index
    %c0_102 = arith.constant 0 : index
    %173 = vector.load %arg7[%c2_100, %c0_101, %c0_102] : memref<4x32x32xf32, #tpu.memory_space<vmem>>, vector<1x32x32xf32>
    %174 = vector.shape_cast %173 : vector<1x32x32xf32> to vector<32x32xf32>
    %c3_103 = arith.constant 3 : index
    %c0_104 = arith.constant 0 : index
    %c0_105 = arith.constant 0 : index
    %175 = vector.load %arg7[%c3_103, %c0_104, %c0_105] : memref<4x32x32xf32, #tpu.memory_space<vmem>>, vector<1x32x32xf32>
    %176 = vector.shape_cast %175 : vector<1x32x32xf32> to vector<32x32xf32>
    %c0_106 = arith.constant 0 : index
    %c0_107 = arith.constant 0 : index
    %c0_108 = arith.constant 0 : index
    %177 = vector.load %arg8[%c0_106, %c0_107, %c0_108] : memref<4x32x32xf32, #tpu.memory_space<vmem>>, vector<1x32x32xf32>
    %178 = vector.shape_cast %177 : vector<1x32x32xf32> to vector<32x32xf32>
    %c1_109 = arith.constant 1 : index
    %c0_110 = arith.constant 0 : index
    %c0_111 = arith.constant 0 : index
    %179 = vector.load %arg8[%c1_109, %c0_110, %c0_111] : memref<4x32x32xf32, #tpu.memory_space<vmem>>, vector<1x32x32xf32>
    %180 = vector.shape_cast %179 : vector<1x32x32xf32> to vector<32x32xf32>
    %c2_112 = arith.constant 2 : index
    %c0_113 = arith.constant 0 : index
    %c0_114 = arith.constant 0 : index
    %181 = vector.load %arg8[%c2_112, %c0_113, %c0_114] : memref<4x32x32xf32, #tpu.memory_space<vmem>>, vector<1x32x32xf32>
    %182 = vector.shape_cast %181 : vector<1x32x32xf32> to vector<32x32xf32>
    %c3_115 = arith.constant 3 : index
    %c0_116 = arith.constant 0 : index
    %c0_117 = arith.constant 0 : index
    %183 = vector.load %arg8[%c3_115, %c0_116, %c0_117] : memref<4x32x32xf32, #tpu.memory_space<vmem>>, vector<1x32x32xf32>
    %184 = vector.shape_cast %183 : vector<1x32x32xf32> to vector<32x32xf32>
    %c0_118 = arith.constant 0 : index
    %c0_119 = arith.constant 0 : index
    %c0_120 = arith.constant 0 : index
    %185 = vector.load %arg9[%c0_118, %c0_119, %c0_120] : memref<4x1x32xf32, #tpu.memory_space<vmem>>, vector<1x1x32xf32>
    %186 = vector.shape_cast %185 : vector<1x1x32xf32> to vector<1x32xf32>
    %c1_121 = arith.constant 1 : index
    %c0_122 = arith.constant 0 : index
    %c0_123 = arith.constant 0 : index
    %187 = vector.load %arg9[%c1_121, %c0_122, %c0_123] : memref<4x1x32xf32, #tpu.memory_space<vmem>>, vector<1x1x32xf32>
    %188 = vector.shape_cast %187 : vector<1x1x32xf32> to vector<1x32xf32>
    %c2_124 = arith.constant 2 : index
    %c0_125 = arith.constant 0 : index
    %c0_126 = arith.constant 0 : index
    %189 = vector.load %arg9[%c2_124, %c0_125, %c0_126] : memref<4x1x32xf32, #tpu.memory_space<vmem>>, vector<1x1x32xf32>
    %190 = vector.shape_cast %189 : vector<1x1x32xf32> to vector<1x32xf32>
    %c3_127 = arith.constant 3 : index
    %c0_128 = arith.constant 0 : index
    %c0_129 = arith.constant 0 : index
    %191 = vector.load %arg9[%c3_127, %c0_128, %c0_129] : memref<4x1x32xf32, #tpu.memory_space<vmem>>, vector<1x1x32xf32>
    %192 = vector.shape_cast %191 : vector<1x1x32xf32> to vector<1x32xf32>
    %cst_130 = arith.constant 0.000000e+00 : f32
    %193 = vector.broadcast %cst_130 : f32 to vector<14x32xf32>
    %cst_131 = arith.constant 0.000000e+00 : f32
    %194 = vector.broadcast %cst_131 : f32 to vector<14x32xf32>
    %cst_132 = arith.constant dense<0.000000e+00> : vector<14x32xf32>
    %195 = tpu.matmul %121, %170, %cst_132 {dimension_numbers = #tpu.dot_dimension_numbers<[1], [0], [0], [1], [0, 0, 1, 1], [], []>} : vector<14x32xf32>, vector<32x32xf32>, vector<14x32xf32> -> vector<14x32xf32>
    %cst_133 = arith.constant dense<0.000000e+00> : vector<14x32xf32>
    %196 = tpu.matmul %193, %178, %cst_133 {dimension_numbers = #tpu.dot_dimension_numbers<[1], [0], [0], [1], [0, 0, 1, 1], [], []>} : vector<14x32xf32>, vector<32x32xf32>, vector<14x32xf32> -> vector<14x32xf32>
    %197 = arith.addf %195, %196 : vector<14x32xf32>
    %198 = vector.broadcast %186 : vector<1x32xf32> to vector<14x32xf32>
    %199 = arith.addf %197, %198 : vector<14x32xf32>
    %cst_134 = arith.constant 5.000000e-01 : f32
    %200 = vector.broadcast %cst_134 : f32 to vector<14x32xf32>
    %201 = arith.mulf %200, %199 : vector<14x32xf32>
    %202 = math.tanh %201 : vector<14x32xf32>
    %cst_135 = arith.constant 1.000000e+00 : f32
    %203 = vector.broadcast %cst_135 : f32 to vector<14x32xf32>
    %204 = arith.addf %202, %203 : vector<14x32xf32>
    %cst_136 = arith.constant 5.000000e-01 : f32
    %205 = vector.broadcast %cst_136 : f32 to vector<14x32xf32>
    %206 = arith.mulf %205, %204 : vector<14x32xf32>
    %cst_137 = arith.constant dense<0.000000e+00> : vector<14x32xf32>
    %207 = tpu.matmul %121, %172, %cst_137 {dimension_numbers = #tpu.dot_dimension_numbers<[1], [0], [0], [1], [0, 0, 1, 1], [], []>} : vector<14x32xf32>, vector<32x32xf32>, vector<14x32xf32> -> vector<14x32xf32>
    %cst_138 = arith.constant dense<0.000000e+00> : vector<14x32xf32>
    %208 = tpu.matmul %193, %180, %cst_138 {dimension_numbers = #tpu.dot_dimension_numbers<[1], [0], [0], [1], [0, 0, 1, 1], [], []>} : vector<14x32xf32>, vector<32x32xf32>, vector<14x32xf32> -> vector<14x32xf32>
    %209 = arith.addf %207, %208 : vector<14x32xf32>
    %210 = vector.broadcast %188 : vector<1x32xf32> to vector<14x32xf32>
    %211 = arith.addf %209, %210 : vector<14x32xf32>
    %cst_139 = arith.constant 5.000000e-01 : f32
    %212 = vector.broadcast %cst_139 : f32 to vector<14x32xf32>
    %213 = arith.mulf %212, %211 : vector<14x32xf32>
    %214 = math.tanh %213 : vector<14x32xf32>
    %cst_140 = arith.constant 1.000000e+00 : f32
    %215 = vector.broadcast %cst_140 : f32 to vector<14x32xf32>
    %216 = arith.addf %214, %215 : vector<14x32xf32>
    %cst_141 = arith.constant 5.000000e-01 : f32
    %217 = vector.broadcast %cst_141 : f32 to vector<14x32xf32>
    %218 = arith.mulf %217, %216 : vector<14x32xf32>
    %cst_142 = arith.constant dense<0.000000e+00> : vector<14x32xf32>
    %219 = tpu.matmul %121, %174, %cst_142 {dimension_numbers = #tpu.dot_dimension_numbers<[1], [0], [0], [1], [0, 0, 1, 1], [], []>} : vector<14x32xf32>, vector<32x32xf32>, vector<14x32xf32> -> vector<14x32xf32>
    %cst_143 = arith.constant dense<0.000000e+00> : vector<14x32xf32>
    %220 = tpu.matmul %193, %182, %cst_143 {dimension_numbers = #tpu.dot_dimension_numbers<[1], [0], [0], [1], [0, 0, 1, 1], [], []>} : vector<14x32xf32>, vector<32x32xf32>, vector<14x32xf32> -> vector<14x32xf32>
    %221 = arith.addf %219, %220 : vector<14x32xf32>
    %222 = vector.broadcast %190 : vector<1x32xf32> to vector<14x32xf32>
    %223 = arith.addf %221, %222 : vector<14x32xf32>
    %224 = math.tanh %223 : vector<14x32xf32>
    %cst_144 = arith.constant dense<0.000000e+00> : vector<14x32xf32>
    %225 = tpu.matmul %121, %176, %cst_144 {dimension_numbers = #tpu.dot_dimension_numbers<[1], [0], [0], [1], [0, 0, 1, 1], [], []>} : vector<14x32xf32>, vector<32x32xf32>, vector<14x32xf32> -> vector<14x32xf32>
    %cst_145 = arith.constant dense<0.000000e+00> : vector<14x32xf32>
    %226 = tpu.matmul %193, %184, %cst_145 {dimension_numbers = #tpu.dot_dimension_numbers<[1], [0], [0], [1], [0, 0, 1, 1], [], []>} : vector<14x32xf32>, vector<32x32xf32>, vector<14x32xf32> -> vector<14x32xf32>
    %227 = arith.addf %225, %226 : vector<14x32xf32>
    %228 = vector.broadcast %192 : vector<1x32xf32> to vector<14x32xf32>
    %229 = arith.addf %227, %228 : vector<14x32xf32>
    %cst_146 = arith.constant 5.000000e-01 : f32
    %230 = vector.broadcast %cst_146 : f32 to vector<14x32xf32>
    %231 = arith.mulf %230, %229 : vector<14x32xf32>
    %232 = math.tanh %231 : vector<14x32xf32>
    %cst_147 = arith.constant 1.000000e+00 : f32
    %233 = vector.broadcast %cst_147 : f32 to vector<14x32xf32>
    %234 = arith.addf %232, %233 : vector<14x32xf32>
    %cst_148 = arith.constant 5.000000e-01 : f32
    %235 = vector.broadcast %cst_148 : f32 to vector<14x32xf32>
    %236 = arith.mulf %235, %234 : vector<14x32xf32>
    %237 = arith.mulf %218, %194 : vector<14x32xf32>
    %238 = arith.mulf %206, %224 : vector<14x32xf32>
    %239 = arith.addf %237, %238 : vector<14x32xf32>
    %240 = math.tanh %239 : vector<14x32xf32>
    %241 = arith.mulf %236, %240 : vector<14x32xf32>
    %cst_149 = arith.constant dense<0.000000e+00> : vector<14x32xf32>
    %242 = tpu.matmul %168, %170, %cst_149 {dimension_numbers = #tpu.dot_dimension_numbers<[1], [0], [0], [1], [0, 0, 1, 1], [], []>} : vector<14x32xf32>, vector<32x32xf32>, vector<14x32xf32> -> vector<14x32xf32>
    %cst_150 = arith.constant dense<0.000000e+00> : vector<14x32xf32>
    %243 = tpu.matmul %241, %178, %cst_150 {dimension_numbers = #tpu.dot_dimension_numbers<[1], [0], [0], [1], [0, 0, 1, 1], [], []>} : vector<14x32xf32>, vector<32x32xf32>, vector<14x32xf32> -> vector<14x32xf32>
    %244 = arith.addf %242, %243 : vector<14x32xf32>
    %245 = vector.broadcast %186 : vector<1x32xf32> to vector<14x32xf32>
    %246 = arith.addf %244, %245 : vector<14x32xf32>
    %cst_151 = arith.constant 5.000000e-01 : f32
    %247 = vector.broadcast %cst_151 : f32 to vector<14x32xf32>
    %248 = arith.mulf %247, %246 : vector<14x32xf32>
    %249 = math.tanh %248 : vector<14x32xf32>
    %cst_152 = arith.constant 1.000000e+00 : f32
    %250 = vector.broadcast %cst_152 : f32 to vector<14x32xf32>
    %251 = arith.addf %249, %250 : vector<14x32xf32>
    %cst_153 = arith.constant 5.000000e-01 : f32
    %252 = vector.broadcast %cst_153 : f32 to vector<14x32xf32>
    %253 = arith.mulf %252, %251 : vector<14x32xf32>
    %cst_154 = arith.constant dense<0.000000e+00> : vector<14x32xf32>
    %254 = tpu.matmul %168, %172, %cst_154 {dimension_numbers = #tpu.dot_dimension_numbers<[1], [0], [0], [1], [0, 0, 1, 1], [], []>} : vector<14x32xf32>, vector<32x32xf32>, vector<14x32xf32> -> vector<14x32xf32>
    %cst_155 = arith.constant dense<0.000000e+00> : vector<14x32xf32>
    %255 = tpu.matmul %241, %180, %cst_155 {dimension_numbers = #tpu.dot_dimension_numbers<[1], [0], [0], [1], [0, 0, 1, 1], [], []>} : vector<14x32xf32>, vector<32x32xf32>, vector<14x32xf32> -> vector<14x32xf32>
    %256 = arith.addf %254, %255 : vector<14x32xf32>
    %257 = vector.broadcast %188 : vector<1x32xf32> to vector<14x32xf32>
    %258 = arith.addf %256, %257 : vector<14x32xf32>
    %cst_156 = arith.constant 5.000000e-01 : f32
    %259 = vector.broadcast %cst_156 : f32 to vector<14x32xf32>
    %260 = arith.mulf %259, %258 : vector<14x32xf32>
    %261 = math.tanh %260 : vector<14x32xf32>
    %cst_157 = arith.constant 1.000000e+00 : f32
    %262 = vector.broadcast %cst_157 : f32 to vector<14x32xf32>
    %263 = arith.addf %261, %262 : vector<14x32xf32>
    %cst_158 = arith.constant 5.000000e-01 : f32
    %264 = vector.broadcast %cst_158 : f32 to vector<14x32xf32>
    %265 = arith.mulf %264, %263 : vector<14x32xf32>
    %cst_159 = arith.constant dense<0.000000e+00> : vector<14x32xf32>
    %266 = tpu.matmul %168, %174, %cst_159 {dimension_numbers = #tpu.dot_dimension_numbers<[1], [0], [0], [1], [0, 0, 1, 1], [], []>} : vector<14x32xf32>, vector<32x32xf32>, vector<14x32xf32> -> vector<14x32xf32>
    %cst_160 = arith.constant dense<0.000000e+00> : vector<14x32xf32>
    %267 = tpu.matmul %241, %182, %cst_160 {dimension_numbers = #tpu.dot_dimension_numbers<[1], [0], [0], [1], [0, 0, 1, 1], [], []>} : vector<14x32xf32>, vector<32x32xf32>, vector<14x32xf32> -> vector<14x32xf32>
    %268 = arith.addf %266, %267 : vector<14x32xf32>
    %269 = vector.broadcast %190 : vector<1x32xf32> to vector<14x32xf32>
    %270 = arith.addf %268, %269 : vector<14x32xf32>
    %271 = math.tanh %270 : vector<14x32xf32>
    %cst_161 = arith.constant dense<0.000000e+00> : vector<14x32xf32>
    %272 = tpu.matmul %168, %176, %cst_161 {dimension_numbers = #tpu.dot_dimension_numbers<[1], [0], [0], [1], [0, 0, 1, 1], [], []>} : vector<14x32xf32>, vector<32x32xf32>, vector<14x32xf32> -> vector<14x32xf32>
    %cst_162 = arith.constant dense<0.000000e+00> : vector<14x32xf32>
    %273 = tpu.matmul %241, %184, %cst_162 {dimension_numbers = #tpu.dot_dimension_numbers<[1], [0], [0], [1], [0, 0, 1, 1], [], []>} : vector<14x32xf32>, vector<32x32xf32>, vector<14x32xf32> -> vector<14x32xf32>
    %274 = arith.addf %272, %273 : vector<14x32xf32>
    %275 = vector.broadcast %192 : vector<1x32xf32> to vector<14x32xf32>
    %276 = arith.addf %274, %275 : vector<14x32xf32>
    %cst_163 = arith.constant 5.000000e-01 : f32
    %277 = vector.broadcast %cst_163 : f32 to vector<14x32xf32>
    %278 = arith.mulf %277, %276 : vector<14x32xf32>
    %279 = math.tanh %278 : vector<14x32xf32>
    %cst_164 = arith.constant 1.000000e+00 : f32
    %280 = vector.broadcast %cst_164 : f32 to vector<14x32xf32>
    %281 = arith.addf %279, %280 : vector<14x32xf32>
    %cst_165 = arith.constant 5.000000e-01 : f32
    %282 = vector.broadcast %cst_165 : f32 to vector<14x32xf32>
    %283 = arith.mulf %282, %281 : vector<14x32xf32>
    %284 = arith.mulf %265, %239 : vector<14x32xf32>
    %285 = arith.mulf %253, %271 : vector<14x32xf32>
    %286 = arith.addf %284, %285 : vector<14x32xf32>
    %287 = math.tanh %286 : vector<14x32xf32>
    %288 = arith.mulf %283, %287 : vector<14x32xf32>
    %289 = vector.extract_strided_slice %241 {offsets = [13, 0], sizes = [1, 32], strides = [1, 1]} : vector<14x32xf32> to vector<1x32xf32>
    %290 = vector.extract_strided_slice %288 {offsets = [13, 0], sizes = [1, 32], strides = [1, 1]} : vector<14x32xf32> to vector<1x32xf32>
    %291 = tpu.concatenate %289, %290 in 0 : vector<1x32xf32>, vector<1x32xf32> -> vector<2x32xf32>
    %c0_166 = arith.constant 0 : index
    %c0_167 = arith.constant 0 : index
    %292 = vector.load %arg10[%c0_166, %c0_167] : memref<32x10xf32, #tpu.memory_space<vmem>>, vector<32x10xf32>
    %cst_168 = arith.constant dense<0.000000e+00> : vector<2x10xf32>
    %293 = tpu.matmul %291, %292, %cst_168 {dimension_numbers = #tpu.dot_dimension_numbers<[1], [0], [0], [1], [0, 0, 1, 1], [], []>} : vector<2x32xf32>, vector<32x10xf32>, vector<2x10xf32> -> vector<2x10xf32>
    %c0_169 = arith.constant 0 : index
    %c0_170 = arith.constant 0 : index
    %294 = vector.load %arg11[%c0_169, %c0_170] : memref<1x10xf32, #tpu.memory_space<vmem>>, vector<1x10xf32>
    %295 = vector.broadcast %294 : vector<1x10xf32> to vector<2x10xf32>
    %296 = arith.addf %293, %295 : vector<2x10xf32>
    %c0_171 = arith.constant 0 : index
    %c0_172 = arith.constant 0 : index
    %297 = vector.load %arg12[%c0_171, %c0_172] : memref<2x10xf32, #tpu.memory_space<vmem>>, vector<2x10xf32>
    tpu.vector_store %arg12[%c0_171, %c0_172], %296 {strides = array<i32>} : memref<2x10xf32, #tpu.memory_space<vmem>>, vector<2x10xf32>,
    return
  }
  func.func @transform_0(%arg0: i32) -> (i32, i32, i32) {
    %c0_i32 = arith.constant 0 : i32
    %c0_i32_0 = arith.constant 0 : i32
    %c0_i32_1 = arith.constant 0 : i32
    %c0_i32_2 = arith.constant 0 : i32
    return %c0_i32, %c0_i32_0, %c0_i32_1 : i32, i32, i32
  }
  func.func @transform_1(%arg0: i32) -> (i32, i32, i32) {
    %c0_i32 = arith.constant 0 : i32
    %c0_i32_0 = arith.constant 0 : i32
    %c0_i32_1 = arith.constant 0 : i32
    %c0_i32_2 = arith.constant 0 : i32
    return %c0_i32, %c0_i32_0, %c0_i32_1 : i32, i32, i32
  }
  func.func @transform_2(%arg0: i32) -> (i32, i32) {
    %c0_i32 = arith.constant 0 : i32
    %c0_i32_0 = arith.constant 0 : i32
    %c0_i32_1 = arith.constant 0 : i32
    return %c0_i32, %c0_i32_0 : i32, i32
  }
  func.func @transform_3(%arg0: i32) -> (i32, i32, i32) {
    %c0_i32 = arith.constant 0 : i32
    %c0_i32_0 = arith.constant 0 : i32
    %c0_i32_1 = arith.constant 0 : i32
    %c0_i32_2 = arith.constant 0 : i32
    return %c0_i32, %c0_i32_0, %c0_i32_1 : i32, i32, i32
  }
  func.func @transform_4(%arg0: i32) -> (i32, i32, i32) {
    %c0_i32 = arith.constant 0 : i32
    %c0_i32_0 = arith.constant 0 : i32
    %c0_i32_1 = arith.constant 0 : i32
    %c0_i32_2 = arith.constant 0 : i32
    return %c0_i32, %c0_i32_0, %c0_i32_1 : i32, i32, i32
  }
  func.func @transform_5(%arg0: i32) -> (i32, i32, i32) {
    %c0_i32 = arith.constant 0 : i32
    %c0_i32_0 = arith.constant 0 : i32
    %c0_i32_1 = arith.constant 0 : i32
    %c0_i32_2 = arith.constant 0 : i32
    return %c0_i32, %c0_i32_0, %c0_i32_1 : i32, i32, i32
  }
  func.func @transform_6(%arg0: i32) -> (i32, i32, i32) {
    %c0_i32 = arith.constant 0 : i32
    %c0_i32_0 = arith.constant 0 : i32
    %c0_i32_1 = arith.constant 0 : i32
    %c0_i32_2 = arith.constant 0 : i32
    return %c0_i32, %c0_i32_0, %c0_i32_1 : i32, i32, i32
  }
  func.func @transform_7(%arg0: i32) -> (i32, i32, i32) {
    %c0_i32 = arith.constant 0 : i32
    %c0_i32_0 = arith.constant 0 : i32
    %c0_i32_1 = arith.constant 0 : i32
    %c0_i32_2 = arith.constant 0 : i32
    return %c0_i32, %c0_i32_0, %c0_i32_1 : i32, i32, i32
  }
  func.func @transform_8(%arg0: i32) -> (i32, i32, i32) {
    %c0_i32 = arith.constant 0 : i32
    %c0_i32_0 = arith.constant 0 : i32
    %c0_i32_1 = arith.constant 0 : i32
    %c0_i32_2 = arith.constant 0 : i32
    return %c0_i32, %c0_i32_0, %c0_i32_1 : i32, i32, i32
  }
  func.func @transform_9(%arg0: i32) -> (i32, i32) {
    %c0_i32 = arith.constant 0 : i32
    %c0_i32_0 = arith.constant 0 : i32
    %c0_i32_1 = arith.constant 0 : i32
    return %c0_i32, %c0_i32_0 : i32, i32
  }
  func.func @transform_10(%arg0: i32) -> (i32, i32) {
    %c0_i32 = arith.constant 0 : i32
    %c0_i32_0 = arith.constant 0 : i32
    %c0_i32_1 = arith.constant 0 : i32
    return %c0_i32, %c0_i32_0 : i32, i32
  }
  func.func @transform_11(%arg0: i32) -> (i32, i32) {
    %c0_i32 = arith.constant 0 : i32
    %c0_i32_0 = arith.constant 0 : i32
    %c0_i32_1 = arith.constant 0 : i32
    return %c0_i32, %c0_i32_0 : i32, i32
  }
}

</mosaic_0001>

<bundles_post_ra>
// kernel: tpu_custom_call.1
= control target key start
LH: loop header
LB: loop body
LE: loop exit
PB: predicated region body
PF: predicated region fallthrough
CT: control target
= control target key end

     0   :  { %16 = vsyncpa [#allocation3], 0  ;;  %s2114_s0 = inlined_call_operand.vmem [shape: f32[2,16,4], index: 0, kind: input, shape index: {}]   ;;  %s2115_s1 = inlined_call_operand.vmem [shape: f32[3,4,8], index: 1, kind: input, shape index: {}]   ;;  %s2116_s2 = inlined_call_operand.vmem [shape: f32[1,8], index: 2, kind: input, shape index: {}]   ;;  %s2117_s3 = inlined_call_operand.vmem [shape: f32[4,8,32], index: 3, kind: input, shape index: {}]   ;;  %s2118_s4 = inlined_call_operand.hbm [shape: f32[4,32,32], index: 4, kind: input, shape index: {}]   ;;  %s2119_s5 = inlined_call_operand.vmem [shape: f32[4,1,32], index: 5, kind: input, shape index: {}]   ;;  %s2120_s6 = inlined_call_operand.hbm [shape: f32[4,32,32], index: 6, kind: input, shape index: {}]   ;;  %s2121_s7 = inlined_call_operand.hbm [shape: f32[4,32,32], index: 7, kind: input, shape index: {}]   ;;  %s2122_s8 = inlined_call_operand.vmem [shape: f32[4,1,32], index: 8, kind: input, shape index: {}]   ;;  %s2123_s9 = inlined_call_operand.vmem [shape: f32[32,10], index: 9, kind: input, shape index: {}]   ;;  %s2124_s10 = inlined_call_operand.vmem [shape: f32[1,10], index: 10, kind: input, shape index: {}]   ;;  %s2125_s11 = inlined_call_operand.hbm [shape: f32[2,10], index: 11, kind: output, shape index: {}]  }
   0x1   :  { %17 = vsyncpa [#allocation6], 0 }
   0x2   :  { %18 = vsyncpa [#allocation4], 0  ;;  %s46_s19 = sshll.u32 %s2120_s6, 4  ;;  %s1700_s20 = smov [#allocation5]   ;;  %s47_s19 = int_to_ptr.hbm [resolvable:$true] %s46_s19 }
   0x3   :  { %s48_s21 = sshll.u32 %s1700_s20, 4  ;;  %s31_s24 = sshll.u32 %s2118_s4, 4  ;;  %s49_s21 = int_to_ptr.vmem [resolvable:$true] %s48_s21  ;;  %s32_s24 = int_to_ptr.hbm [resolvable:$true] %s31_s24 }
   0x4   :  { %s1701_s25 = smov 128   ;;  %s1702_s26 = smov 8  }
   0x5   :  { %54 = dma.hbm_to_vmem [thread:$0]  %s47_s19, 2048, %s49_s21, [#allocation6], %s1701_s25, %s1701_s25, %s1702_s26  }
   0x6   :  { %s1703_s27 = smov [#allocation2]   ;;  %s59_s12 = sshll.u32 %s2121_s7, 4  ;;  %s60_s12 = int_to_ptr.hbm [resolvable:$true] %s59_s12 }
   0x7   :  { %s33_s28 = sshll.u32 %s1703_s27, 4  ;;  %s1704_s6 = smov [#allocation7]   ;;  %s34_s28 = int_to_ptr.vmem [resolvable:$true] %s33_s28 }
   0x8   :  { %39 = dma.hbm_to_vmem [thread:$0]  %s32_s24, 2048, %s34_s28, [#allocation3], %s1701_s25, %s1701_s25, %s1702_s26  }
   0x9   :  { %s61_s13 = sshll.u32 %s1704_s6, 4  ;;  %s62_s13 = int_to_ptr.vmem [resolvable:$true] %s61_s13 }
   0xa   :  { %67 = dma.hbm_to_vmem [thread:$0]  %s60_s12, 2048, %s62_s13, [#allocation6], %s1701_s25, %s1701_s25, %s1702_s26  }
   0xb   :  { %1694 = dma.done.wait [#allocation3], 2048  }
   0xc   :  { %1695 = vsyncadd [#allocation3], 4294965248 }
   0xd   :  { %1696 = dma.done.wait [#allocation6], 4096  }
   0xe   :  { %1697 = vsyncadd [#allocation6], 4294963200  ;;  %vm105_vm0 = vcmask 1043456   ;;  %vm100_vm1 = vcmask 31744   ;;  %v1431_v0 = vld [vmem:[%s2115_s1 + $0x8] sm:$0xf] }
   0xf   :  { %v92_v1 = vld [vmem:[%s2114_s0] sm:$0xff]  ;;  %v93_v2 = vld [vmem:[%s2114_s0 + $0x8] sm:$0xff]  ;;  %vm162_vm2 = vcmask 1045504   ;;  %vm96_vm3 = vcmask 1046528   ;;  %1438 = vmatpush.msk.msra.mxu2 %vm105_vm0, %v1431_v0  ;;  %v1441_v9 = vld [vmem:[%s2114_s0 + $0x10] sm:$0xff]  ;;  %v1705_v30 = vmov 0.0  }
  0x10   :  { %v163_v3 = vrot.slane %v92_v1, 2  ;;  %v164_v4 = vrot.slane %v93_v2, 2  ;;  %v1430_v5 = vld [vmem:[%s2115_s1 + $0x4] sm:$0xf]  ;;  %v87_v6 = vld [vmem:[%s2115_s1] sm:$0xf] }
  0x11   :  { %1432 = vmatpush.msk.msra.mxu0 %vm105_vm0, %v1430_v5  ;;  %1435 = vmatpush.msk.msra.mxu1 %vm105_vm0, %v87_v6  ;;  %v97_v7 = vrot.slane %v92_v1, 1  ;;  %v98_v8 = vrot.slane %v93_v2, 1  ;;  %v1442_v10 = vld [vmem:[%s2114_s0 + $0x18] sm:$0xff]  ;;  %v236_v13 = vrot.slane %v1441_v9, 1  ;;  %v293_v16 = vrot.slane %v1441_v9, 2  ;;  %v1823_v21 = vld [vmem:[%s2117_s3] sm:$0xff] }
  0x12   :  { %v165_v11 = vsel %vm162_vm2, %v163_v3, %v164_v4  ;;  %1436 = vmatmul.msk.f32.vlgmr.msra.gmra.mxu1 %vm100_vm1, %v92_v1  ;;  %1510 = vmatpush.msk.msra.mxu3 %vm105_vm0, %v1430_v5  ;;  %v237_v14 = vrot.slane %v1442_v10, 1  ;;  %v294_v17 = vrot.slane %v1442_v10, 2  ;;  %v364_v19 = vld [vmem:[#allocation2 + $0x18] sm:$0xff]  ;;  %v363_v22 = vld [vmem:[#allocation2 + $0x10] sm:$0xff]  ;;  %v362_v23 = vld [vmem:[#allocation2 + $0x8] sm:$0xff]  ;;  %vm207_vm4 = vcmask 1040384  }
  0x13   :  { %1439 = vmatmul.msk.f32.vlgmr.msra.gmra.mxu2 %vm100_vm1, %v165_v11  ;;  %v99_v12 = vsel %vm96_vm3, %v97_v7, %v98_v8  ;;  %1434 = vmatmul.msk.f32.vlgmr.msra.gmra.mxu3 %vm100_vm1, %v98_v8  ;;  %v369_v20 = vld [vmem:[#allocation2 + $0x38] sm:$0xff]  ;;  %v368_v24 = vld [vmem:[#allocation2 + $0x30] sm:$0xff]  ;;  %v1829_v25 = vld [vmem:[%s2117_s3 + $0x8] sm:$0xff]  ;;  %vm414_vm5 = vcmask 64512   ;;  %vm387_vm6 = vcmask 261120   ;;  %s1706_s12 = smov [#allocation8]  }
  0x14   :  { %1433 = vmatmul.msk.f32.vlgmr.msra.gmra.mxu0 %vm100_vm1, %v99_v12  ;;  %1443 = vmatpush.msk.msrb.mxu3 %vm105_vm0, %v1430_v5  ;;  %v238_v15 = vsel %vm96_vm3, %v236_v13, %v237_v14  ;;  %v295_v18 = vsel %vm162_vm2, %v293_v16, %v294_v17  ;;  %v367_v26 = vld [vmem:[#allocation2 + $0x28] sm:$0xff]  ;;  %v361_v27 = vld [vmem:[#allocation2] sm:$0xff]  ;;  %v374_v31 = vld [vmem:[#allocation2 + $0x58] sm:$0xff]  ;;  %s1417_s6 = sshll.u32 %s1706_s12, 4  ;;  %vm1410_vm7 = vcmask 74752   ;;  %s1418_s6 = int_to_ptr.vmem [resolvable:$true] %s1417_s6 }
  0x15   :  { %1446 = vmatpush.msk.msrb.mxu0 %vm105_vm0, %v87_v6  ;;  %1449 = vmatpush.msk.msrb.mxu1 %vm105_vm0, %v1431_v0  ;;  %v366_v28 = vld [vmem:[#allocation2 + $0x20] sm:$0xff]  ;;  %v1837_v32 = vld [vmem:[%s2117_s3 + $0x10] sm:$0xff]  ;;  %v372_v41 = vld [vmem:[#allocation2 + $0x48] sm:$0xff] }
  0x16   :  { %403 = vmatpush.msrb.mxu2 %v364_v19  ;;  %436 = vmatpush.msra.mxu3 %v1823_v21  ;;  %v373_v33 = vld [vmem:[#allocation2 + $0x50] sm:$0xff]  ;;  %v1843_v37 = vld [vmem:[%s2116_s2] ss:$0 sm:$0xff]  ;;  %v379_v42 = vld [vmem:[#allocation2 + $0x78] sm:$0xff] }
  0x17   :  { %469 = vmatpush.msra.mxu0 %v369_v20  ;;  %495 = vmatpush.msra.mxu1 %v1829_v25  ;;  %v378_v43 = vld [vmem:[#allocation2 + $0x70] sm:$0xff]  ;;  %v1850_v44 = vld [vmem:[%s2117_s3 + $0x18] sm:$0xff]  ;;  %v371_v45 = vld [vmem:[#allocation2 + $0x40] sm:$0xff]  ;;  %s1419_s3 = sshll.u32 %s2125_s11, 4  ;;  %s1420_s3 = int_to_ptr.hbm [resolvable:$true] %s1419_s3 }
  0x18   :  { %404 = vmatpush.msrb.mxu2 %v363_v22  ;;  %v377_v47 = vld [vmem:[#allocation2 + $0x68] sm:$0xff]  ;;  %v376_v49 = vld [vmem:[#allocation2 + $0x60] sm:$0xff] }
  0x19   :  { %470 = vmatpush.msra.mxu0 %v368_v24 }
  0x1a   :  { %1437 = vmatmul.msk.f32.gmra.mxu1 %vm100_vm1, %v93_v2  ;;  %405 = vmatpush.msrb.mxu2 %v362_v23 }
  0x1b   :  { %1440 = vmatmul.msk.f32.gmra.mxu2 %vm100_vm1, %v164_v4  ;;  %1444 = vmatmul.msk.f32.vlgmr.msrb.gmra.mxu3 %vm100_vm1, %v238_v15 }
  0x1c   :  { %1447 = vmatmul.msk.f32.vlgmr.msrb.gmra.mxu0 %vm100_vm1, %v1441_v9  ;;  %406 = vmatpush.msrb.mxu2 %v361_v27 }
  0x1d   :  { %471 = vmatpush.msra.mxu0 %v367_v26  ;;  %554 = vmatpush.msrb.mxu3 %v1837_v32 }
  0x1e   :  { %528 = vmatpush.msra.mxu2 %v374_v31 }
  0x1f   :  { %472 = vmatpush.msra.mxu0 %v366_v28 }
  0x20   :  { %529 = vmatpush.msra.mxu2 %v373_v33 }
  0x21   :  { %581 = vmatpush.msrb.mxu0 %v379_v42 }
  0x22   :  { %1450 = vmatmul.msk.f32.vlgmr.msrb.gmra.mxu1 %vm100_vm1, %v295_v18  ;;  %530 = vmatpush.msra.mxu2 %v372_v41 }
  0x23   :  { %1445 = vmatmul.msk.f32.gmra.mxu3 %vm100_vm1, %v237_v14  ;;  %407 = vmatmul.f32.vlgmr.msrb.gmra.mxu2 %v1705_v30 }
  0x24   :  { %1448 = vmatmul.msk.f32.gmra.mxu0 %vm100_vm1, %v1442_v10  ;;  %607 = vmatpush.msrb.mxu1 %v1850_v44 }
  0x25   :  { %582 = vmatpush.msrb.mxu0 %v378_v43  ;;  %531 = vmatpush.msra.mxu2 %v371_v45 }
  0x27   :  { %656 = vmatpush.msrb.mxu2 %v364_v19  ;;  %583 = vmatpush.msrb.mxu0 %v377_v47 }
  0x29   :  { %657 = vmatpush.msrb.mxu2 %v363_v22  ;;  %584 = vmatpush.msrb.mxu0 %v376_v49 }
  0x2a   :  { %1451 = vmatmul.msk.f32.gmra.mxu1 %vm100_vm1, %v294_v17 }
  0x2b   :  { %410 = vmatmul.f32.gmra.mxu2 %v1705_v30 }
  0x2c   :  { %473 = vmatmul.f32.vlgmr.msra.gmra.mxu0 %v1705_v30  ;;  %658 = vmatpush.msrb.mxu2 %v362_v23 }
  0x2d   :  { %718 = vmatpush.msra.mxu0 %v369_v20 }
  0x2e   :  { %659 = vmatpush.msrb.mxu2 %v361_v27 }
  0x2f   :  { %719 = vmatpush.msra.mxu0 %v368_v24 }
  0x31   :  { %720 = vmatpush.msra.mxu0 %v367_v26 }
  0x33   :  { %532 = vmatmul.f32.vlgmr.msra.gmra.mxu2 %v1705_v30  ;;  %721 = vmatpush.msra.mxu0 %v366_v28 }
  0x34   :  { %476 = vmatmul.f32.gmra.mxu0 %v1705_v30  ;;  %774 = vmatpush.msra.mxu2 %v374_v31 }
  0x36   :  { %775 = vmatpush.msra.mxu2 %v373_v33 }
  0x38   :  { %776 = vmatpush.msra.mxu2 %v372_v41  ;;  %v1894_v41 = vld [vmem:[%s2119_s5 + $0x1] ss:$0 sm:$0xff] }
  0x3a   :  { %777 = vmatpush.msra.mxu2 %v371_v45  ;;  %v1901_v45 = vld [vmem:[#allocation5 + $0x18] sm:$0xff] }
  0x3b   :  { %535 = vmatmul.f32.gmra.mxu2 %v1705_v30 }
  0x3c   :  { %585 = vmatmul.f32.vlgmr.msrb.gmra.mxu0 %v1705_v30 }
  0x3d   :  { %824 = vmatpush.msrb.mxu0 %v379_v42 }
  0x3f   :  { %825 = vmatpush.msrb.mxu0 %v378_v43 }
  0x41   :  { %826 = vmatpush.msrb.mxu0 %v377_v47 }
  0x43   :  { %827 = vmatpush.msrb.mxu0 %v376_v49 }
  0x44   :  { %588 = vmatmul.f32.gmra.mxu0 %v1705_v30 }
  0x8f   :  { %v156_v29 = vpop.f32.mrf.mxu1 }
  0x91   :  { %v126_v34 = vpop.f32.mrf.mxu0 }
  0x92   :  { %v157_v35 = vadd.f32 %v156_v29, %v126_v34 }
  0x96   :  { %v190_v36 = vpop.f32.mrf.mxu2  ;;  %v129_v39 = vpop.f32.mrf.mxu3 }
  0x97   :  { %v196_v38 = vadd.f32 %v190_v36, %v157_v35  ;;  %v159_v40 = vpop.f32.mrf.mxu1 }
  0x98   :  { %v160_v48 = vadd.f32 %v159_v40, %v129_v39 }
  0x99   :  { %v201_v46 = vadd.f32 %v1843_v37, %v196_v38  ;;  %v287_v61 = vpop.f32.mrf.mxu0 }
  0x9b   :  { %v203_v50 = vmax.f32 %v201_v46, 0.0  ;;  %v1903_v46 = vld [vmem:[#allocation5 + $0x38] sm:$0xff] }
  0x9d   :  { %v208_v54 = vrot.slane %v203_v50, 7  ;;  %v1908_v50 = vld [vmem:[#allocation5 + $0x10] sm:$0xff] }
  0x9e   :  { %v193_v51 = vpop.f32.mrf.mxu2  ;;  %v260_v60 = vpop.f32.mrf.mxu3 }
  0x9f   :  { %v197_v52 = vadd.f32 %v193_v51, %v160_v48  ;;  %v213_v57 = vsel %vm207_vm4, 0.0, %v208_v54  ;;  %v288_v1 = vadd.f32 %v287_v61, %v260_v60  ;;  %v317_v2 = vpop.f32.mrf.mxu1  ;;  %v1910_v51 = vld [vmem:[#allocation5 + $0x30] sm:$0xff] }
  0xa0   :  { %v217_v62 = vrot.slane %v213_v57, 1  ;;  %v224_v3 = vrot.slane %v213_v57, 2 }
  0xa1   :  { %v202_v53 = vadd.f32 %v1843_v37, %v197_v52  ;;  %v323_v5 = vadd.f32 %v317_v2, %v288_v1  ;;  %v290_v11 = vpop.f32.mrf.mxu0 }
  0xa3   :  { %v204_v55 = vmax.f32 %v202_v53, 0.0  ;;  %v325_v9 = vadd.f32 %v1843_v37, %v323_v5  ;;  %v1915_v53 = vld [vmem:[#allocation5 + $0x8] sm:$0xff] }
  0xa5   :  { %v209_v56 = vrot.slane %v204_v55, 7  ;;  %v327_v15 = vmax.f32 %v325_v9, 0.0 }
  0xa6   :  { %v263_v10 = vpop.f32.mrf.mxu3 }
  0xa7   :  { %v210_v58 = vsel %vm207_vm4, %v208_v54, %v209_v56  ;;  %v291_v12 = vadd.f32 %v290_v11, %v263_v10  ;;  %v320_v13 = vpop.f32.mrf.mxu1  ;;  %v331_v19 = vrot.slane %v327_v15, 7  ;;  %v1917_v54 = vld [vmem:[#allocation5 + $0x28] sm:$0xff]  ;;  %v1942_v15 = vld [vmem:[#allocation5 + $0x78] sm:$0xff] }
  0xa8   :  { %v214_v59 = vsel %vm96_vm3, %v210_v58, 0.0  ;;  %v1921_v58 = vld [vmem:[#allocation5] sm:$0xff] }
  0xa9   :  { %v218_v63 = vrot.slane %v214_v59, 1  ;;  %v225_v0 = vrot.slane %v214_v59, 2  ;;  %v324_v16 = vadd.f32 %v320_v13, %v291_v12  ;;  %v336_v24 = vsel %vm207_vm4, 0.0, %v331_v19  ;;  %v474_v36 = vpop.f32.mrf.mxu0 }
  0xaa   :  { %v347_v27 = vrot.slane %v336_v24, 2 }
  0xab   :  { %v219_v4 = vsel %vm96_vm3, %v217_v62, %v218_v63  ;;  %v226_v7 = vsel %vm162_vm2, %v224_v3, %v225_v0  ;;  %v223_v14 = vmax.f32 %v214_v59, %v218_v63  ;;  %v326_v17 = vadd.f32 %v1843_v37, %v324_v16  ;;  %v408_v37 = vpop.f32.mrf.mxu2  ;;  %v1923_v59 = vld [vmem:[#allocation5 + $0x20] sm:$0xff]  ;;  %v1944_v16 = vld [vmem:[#allocation5 + $0x50] sm:$0xff] }
  0xac   :  { %v222_v6 = vmax.f32 %v213_v57, %v219_v4  ;;  %v1932_v3 = vld [vmem:[%s2119_s5 + $0x3] ss:$0 sm:$0xff] }
  0xad   :  { %v230_v18 = vmax.f32 %v223_v14, %v225_v0  ;;  %v328_v20 = vmax.f32 %v326_v17, 0.0  ;;  %v1940_v14 = vld [vmem:[#allocation5 + $0x58] sm:$0xff] }
  0xae   :  { %v229_v8 = vmax.f32 %v222_v6, %v226_v7  ;;  %v1937_v6 = vld [vmem:[%s2119_s5 + $0x2] ss:$0 sm:$0xff] }
  0xaf   :  { %v332_v22 = vrot.slane %v328_v20, 7  ;;  %v1949_v20 = vld [vmem:[#allocation5 + $0x70] sm:$0xff] }
  0xb0   :  { %1458 = vmatmul.msk.f32.vlgmr.msra.gmra.mxu3 %vm414_vm5, %v229_v8  ;;  %1460 = vmatmul.msk.f32.vlgmr.msra.gmra.mxu1 %vm414_vm5, %v229_v8 }
  0xb1   :  { %688 = vmatpush.msra.mxu3 %v1823_v21  ;;  %744 = vmatpush.msra.mxu1 %v1829_v25  ;;  %v333_v23 = vsel %vm207_vm4, %v331_v19, %v332_v22  ;;  %v340_v25 = vrot.slane %v336_v24, 1  ;;  %v477_v39 = vpop.f32.mrf.mxu0 }
  0xb2   :  { %v337_v21 = vsel %vm96_vm3, %v333_v23, 0.0 }
  0xb3   :  { %v341_v26 = vrot.slane %v337_v21, 1  ;;  %v348_v28 = vrot.slane %v337_v21, 2  ;;  %v411_v48 = vpop.f32.mrf.mxu2 }
  0xb5   :  { %v342_v29 = vsel %vm96_vm3, %v340_v25, %v341_v26  ;;  %v349_v33 = vsel %vm162_vm2, %v347_v27, %v348_v28  ;;  %v346_v35 = vmax.f32 %v337_v21, %v341_v26  ;;  %v1953_v21 = vld [vmem:[#allocation5 + $0x68] sm:$0xff]  ;;  %v1957_v27 = vld [vmem:[#allocation5 + $0x40] sm:$0xff] }
  0xb6   :  { %v345_v31 = vmax.f32 %v336_v24, %v342_v29  ;;  %v1951_v24 = vld [vmem:[#allocation5 + $0x48] sm:$0xff] }
  0xb8   :  { %1459 = vmatmul.msk.f32.gmra.mxu3 %vm414_vm5, %v230_v18  ;;  %1461 = vmatmul.msk.f32.gmra.mxu1 %vm414_vm5, %v230_v18  ;;  %v352_v34 = vmax.f32 %v345_v31, %v349_v33 }
  0xb9   :  { %v586_v55 = vpop.f32.mrf.mxu0 }
  0xbb   :  { %v533_v4 = vpop.f32.mrf.mxu2 }
  0xc0   :  { %1462 = vmatmul.msk.f32.vlgmr.msrb.gmra.mxu3 %vm414_vm5, %v229_v8  ;;  %1464 = vmatmul.msk.f32.vlgmr.msrb.gmra.mxu1 %vm414_vm5, %v229_v8 }
  0xc1   :  { %800 = vmatpush.msrb.mxu3 %v1837_v32  ;;  %850 = vmatpush.msrb.mxu1 %v1850_v44  ;;  %v353_v32 = vmax.f32 %v346_v35, %v348_v28  ;;  %v1899_v44 = vld [vmem:[%s2119_s5] ss:$0 sm:$0xff]  ;;  %v589_v10 = vpop.f32.mrf.mxu0 }
  0xc2   :  { %v1959_v28 = vld [vmem:[#allocation5 + $0x60] sm:$0xff] }
  0xc3   :  { %v536_v26 = vpop.f32.mrf.mxu2 }
  0xc8   :  { %1463 = vmatmul.msk.f32.gmra.mxu3 %vm414_vm5, %v230_v18  ;;  %1465 = vmatmul.msk.f32.gmra.mxu1 %vm414_vm5, %v230_v18 }
  0xd0   :  { %1468 = vmatmul.msk.f32.vlgmr.msra.gmra.mxu3 %vm414_vm5, %v352_v34  ;;  %1472 = vmatmul.msk.f32.vlgmr.msra.gmra.mxu1 %vm414_vm5, %v352_v34 }
  0xd1   :  { %958 = vmatpush.msra.mxu3 %v1901_v45  ;;  %1017 = vmatpush.msra.mxu1 %v1903_v46 }
  0xd3   :  { %959 = vmatpush.msra.mxu3 %v1908_v50  ;;  %1018 = vmatpush.msra.mxu1 %v1910_v51 }
  0xd5   :  { %960 = vmatpush.msra.mxu3 %v1915_v53  ;;  %1019 = vmatpush.msra.mxu1 %v1917_v54 }
  0xd7   :  { %961 = vmatpush.msra.mxu3 %v1921_v58  ;;  %1020 = vmatpush.msra.mxu1 %v1923_v59 }
  0xd8   :  { %1469 = vmatmul.msk.f32.gmra.mxu3 %vm414_vm5, %v353_v32  ;;  %1473 = vmatmul.msk.f32.gmra.mxu1 %vm414_vm5, %v353_v32 }
  0xe0   :  { %1476 = vmatmul.msk.f32.vlgmr.msrb.gmra.mxu3 %vm414_vm5, %v352_v34  ;;  %1480 = vmatmul.msk.f32.vlgmr.msrb.gmra.mxu1 %vm414_vm5, %v352_v34 }
  0xe1   :  { %1076 = vmatpush.msrb.mxu3 %v1940_v14  ;;  %1129 = vmatpush.msrb.mxu1 %v1942_v15 }
  0xe3   :  { %1077 = vmatpush.msrb.mxu3 %v1944_v16  ;;  %1130 = vmatpush.msrb.mxu1 %v1949_v20 }
  0xe5   :  { %1078 = vmatpush.msrb.mxu3 %v1951_v24  ;;  %1131 = vmatpush.msrb.mxu1 %v1953_v21 }
  0xe7   :  { %1079 = vmatpush.msrb.mxu3 %v1957_v27  ;;  %1132 = vmatpush.msrb.mxu1 %v1959_v28 }
  0xe8   :  { %1477 = vmatmul.msk.f32.gmra.mxu3 %vm414_vm5, %v353_v32  ;;  %1481 = vmatmul.msk.f32.gmra.mxu1 %vm414_vm5, %v353_v32 }
 0x12d   :  { %v497_v38 = vpop.f32.mrf.mxu1 }
 0x12e   :  { %v498_v40 = vadd.f32 %v497_v38, %v474_v36 }
 0x130   :  { %v506_v49 = vadd.f32 %v1894_v41, %v498_v40 }
 0x132   :  { %v508_v56 = vmul.f32 0.5, %v506_v49 }
 0x133   :  { %v438_v42 = vpop.f32.mrf.mxu3 }
 0x134   :  { %v439_v43 = vadd.f32 %v438_v42, %v408_v37  ;;  %1528 = vtanh.f32 %v508_v56 }
 0x135   :  { %v500_v47 = vpop.f32.mrf.mxu1 }
 0x136   :  { %v447_v52 = vadd.f32 %v1899_v44, %v439_v43  ;;  %v501_v57 = vadd.f32 %v500_v47, %v477_v39 }
 0x138   :  { %v449_v61 = vmul.f32 0.5, %v447_v52  ;;  %v507_v0 = vadd.f32 %v1894_v41, %v501_v57 }
 0x13a   :  { %1530 = vtanh.f32 %v449_v61  ;;  %v509_v5 = vmul.f32 0.5, %v507_v0  ;;  %v1529_v11 = vpop.eup %1528 }
 0x13b   :  { %v441_v60 = vpop.f32.mrf.mxu3  ;;  %v512_v22 = vadd.f32 1.0, %v1529_v11  ;;  %v903_v11 = vld [vmem:[#allocation7 + $0x28] sm:$0xff] }
 0x13c   :  { %v442_v62 = vadd.f32 %v441_v60, %v411_v48  ;;  %1532 = vtanh.f32 %v509_v5  ;;  %v1975_v5 = vld [vmem:[#allocation7 + $0x38] sm:$0xff] }
 0x13d   :  { %v609_v63 = vpop.f32.mrf.mxu1  ;;  %v514_v31 = vmul.f32 0.5, %v512_v22 }
 0x13e   :  { %v448_v1 = vadd.f32 %v1899_v44, %v442_v62  ;;  %v610_v2 = vadd.f32 %v609_v63, %v586_v55 }
 0x13f   :  { %v628_v40 = vmul.f32 0.0, %v514_v31 }
 0x140   :  { %v450_v7 = vmul.f32 0.5, %v448_v1  ;;  %v618_v8 = vadd.f32 %v1932_v3, %v610_v2  ;;  %v1531_v17 = vpop.eup %1530 }
 0x141   :  { %v453_v25 = vadd.f32 1.0, %v1531_v17 }
 0x142   :  { %1534 = vtanh.f32 %v450_v7  ;;  %v620_v23 = vmul.f32 0.5, %v618_v8  ;;  %v1533_v34 = vpop.eup %1532  ;;  %v1981_v8 = vld [vmem:[#allocation7 + $0x10] sm:$0xff] }
 0x143   :  { %v556_v9 = vpop.f32.mrf.mxu3  ;;  %v455_v36 = vmul.f32 0.5, %v453_v25  ;;  %v513_v42 = vadd.f32 1.0, %v1533_v34 }
 0x144   :  { %v557_v12 = vadd.f32 %v556_v9, %v533_v4  ;;  %v1973_v4 = vld [vmem:[#allocation7 + $0x18] sm:$0xff]  ;;  %v1983_v9 = vld [vmem:[#allocation7 + $0x30] sm:$0xff] }
 0x145   :  { %v612_v13 = vpop.f32.mrf.mxu1  ;;  %v515_v52 = vmul.f32 0.5, %v513_v42 }
 0x146   :  { %v565_v18 = vadd.f32 %v1937_v6, %v557_v12  ;;  %v613_v19 = vadd.f32 %v612_v13, %v589_v10  ;;  %v898_v10 = vld [vmem:[#allocation7 + $0x8] sm:$0xff] }
 0x147   :  { %v629_v60 = vmul.f32 0.0, %v515_v52 }
 0x148   :  { %1536 = vtanh.f32 %v565_v18  ;;  %v619_v29 = vadd.f32 %v1932_v3, %v613_v19  ;;  %v1535_v32 = vpop.eup %1534  ;;  %v897_v18 = vld [vmem:[#allocation7] sm:$0xff] }
 0x149   :  { %1538 = vtanh.f32 %v620_v23  ;;  %v454_v48 = vadd.f32 1.0, %v1535_v32  ;;  %v902_v19 = vld [vmem:[#allocation7 + $0x20] sm:$0xff] }
 0x14a   :  { %v621_v38 = vmul.f32 0.5, %v619_v29 }
 0x14b   :  { %v559_v33 = vpop.f32.mrf.mxu3  ;;  %v456_v56 = vmul.f32 0.5, %v454_v48 }
 0x14c   :  { %v560_v35 = vadd.f32 %v559_v33, %v536_v26 }
 0x14e   :  { %v1537_v37 = vpop.eup %1536  ;;  %v566_v39 = vadd.f32 %v1937_v6, %v560_v35 }
 0x14f   :  { %v630_v43 = vmul.f32 %v1537_v37, %v455_v36  ;;  %v1539_v47 = vpop.eup %1538 }
 0x150   :  { %1540 = vtanh.f32 %v566_v39  ;;  %v624_v55 = vadd.f32 1.0, %v1539_v47 }
 0x151   :  { %v1967_v49 = vadd.f32 %v630_v43, %v628_v40  ;;  %1542 = vtanh.f32 %v621_v38 }
 0x152   :  { %v626_v63 = vmul.f32 0.5, %v624_v55 }
 0x153   :  { %1544 = vtanh.f32 %v1967_v49 }
 0x156   :  { %v1541_v57 = vpop.eup %1540 }
 0x157   :  { %v631_v61 = vmul.f32 %v1541_v57, %v456_v56  ;;  %v1543_v62 = vpop.eup %1542 }
 0x158   :  { %v625_v7 = vadd.f32 1.0, %v1543_v62 }
 0x159   :  { %v1545_v0 = vpop.eup %1544  ;;  %v1970_v1 = vadd.f32 %v631_v61, %v629_v60 }
 0x15a   :  { %v636_v2 = vmul.f32 %v1545_v0, %v626_v63  ;;  %v627_v12 = vmul.f32 0.5, %v625_v7 }
 0x15b   :  { %1546 = vtanh.f32 %v1970_v1 }
 0x15c   :  { %1466 = vmatmul.msk.f32.vlgmr.msrb.gmra.mxu2 %vm387_vm6, %v636_v2  ;;  %1470 = vmatmul.msk.f32.vlgmr.msra.gmra.mxu0 %vm387_vm6, %v636_v2 }
 0x15d   :  { %1485 = vmatmul.msk.f32.vlgmr.msra.gmra.mxu3 %vm387_vm6, %v636_v2  ;;  %1487 = vmatmul.msk.f32.vlgmr.msra.gmra.mxu1 %vm387_vm6, %v636_v2 }
 0x15e   :  { %935 = vmatpush.msrb.mxu2 %v1973_v4  ;;  %994 = vmatpush.msra.mxu0 %v1975_v5 }
 0x15f   :  { %1209 = vmatpush.msra.mxu3 %v1901_v45  ;;  %1258 = vmatpush.msra.mxu1 %v1903_v46  ;;  %v910_v45 = vld [vmem:[#allocation7 + $0x58] sm:$0xff] }
 0x160   :  { %936 = vmatpush.msrb.mxu2 %v1981_v8  ;;  %995 = vmatpush.msra.mxu0 %v1983_v9  ;;  %v915_v46 = vld [vmem:[#allocation7 + $0x78] sm:$0xff] }
 0x161   :  { %v1547_v13 = vpop.eup %1546  ;;  %1210 = vmatpush.msra.mxu3 %v1908_v50  ;;  %1259 = vmatpush.msra.mxu1 %v1910_v51  ;;  %v909_v50 = vld [vmem:[#allocation7 + $0x50] sm:$0xff] }
 0x162   :  { %v637_v17 = vmul.f32 %v1547_v13, %v627_v12  ;;  %937 = vmatpush.msrb.mxu2 %v898_v10  ;;  %996 = vmatpush.msra.mxu0 %v903_v11  ;;  %v914_v51 = vld [vmem:[#allocation7 + $0x70] sm:$0xff] }
 0x163   :  { %1211 = vmatpush.msra.mxu3 %v1915_v53  ;;  %1260 = vmatpush.msra.mxu1 %v1917_v54  ;;  %v908_v53 = vld [vmem:[#allocation7 + $0x48] sm:$0xff] }
 0x164   :  { %1467 = vmatmul.msk.f32.gmra.mxu2 %vm387_vm6, %v637_v17  ;;  %1471 = vmatmul.msk.f32.gmra.mxu0 %vm387_vm6, %v637_v17  ;;  %v913_v54 = vld [vmem:[#allocation7 + $0x68] sm:$0xff] }
 0x165   :  { %1486 = vmatmul.msk.f32.gmra.mxu3 %vm387_vm6, %v637_v17  ;;  %1488 = vmatmul.msk.f32.gmra.mxu1 %vm387_vm6, %v637_v17 }
 0x166   :  { %938 = vmatpush.msrb.mxu2 %v897_v18  ;;  %997 = vmatpush.msra.mxu0 %v902_v19 }
 0x167   :  { %1212 = vmatpush.msra.mxu3 %v1921_v58  ;;  %1261 = vmatpush.msra.mxu1 %v1923_v59  ;;  %v907_v58 = vld [vmem:[#allocation7 + $0x40] sm:$0xff] }
 0x168   :  { %v912_v59 = vld [vmem:[#allocation7 + $0x60] sm:$0xff] }
 0x16c   :  { %1474 = vmatmul.msk.f32.vlgmr.msra.gmra.mxu2 %vm387_vm6, %v636_v2  ;;  %1478 = vmatmul.msk.f32.vlgmr.msrb.gmra.mxu0 %vm387_vm6, %v636_v2 }
 0x16d   :  { %1489 = vmatmul.msk.f32.vlgmr.msrb.gmra.mxu3 %vm387_vm6, %v636_v2  ;;  %1491 = vmatmul.msk.f32.vlgmr.msrb.gmra.mxu1 %vm387_vm6, %v636_v2 }
 0x16e   :  { %1053 = vmatpush.msra.mxu2 %v910_v45  ;;  %1106 = vmatpush.msrb.mxu0 %v915_v46 }
 0x16f   :  { %1307 = vmatpush.msrb.mxu3 %v1940_v14  ;;  %1353 = vmatpush.msrb.mxu1 %v1942_v15  ;;  %v746_v14 = vpop.f32.mrf.mxu1  ;;  %v690_v15 = vpop.f32.mrf.mxu3 }
 0x170   :  { %1054 = vmatpush.msra.mxu2 %v909_v50  ;;  %1107 = vmatpush.msrb.mxu0 %v914_v51 }
 0x171   :  { %1308 = vmatpush.msrb.mxu3 %v1944_v16  ;;  %1354 = vmatpush.msrb.mxu1 %v1949_v20 }
 0x172   :  { %1055 = vmatpush.msra.mxu2 %v908_v53  ;;  %1108 = vmatpush.msrb.mxu0 %v913_v54 }
 0x173   :  { %1309 = vmatpush.msrb.mxu3 %v1951_v24  ;;  %1355 = vmatpush.msrb.mxu1 %v1953_v21 }
 0x174   :  { %1475 = vmatmul.msk.f32.gmra.mxu2 %vm387_vm6, %v637_v17  ;;  %1479 = vmatmul.msk.f32.gmra.mxu0 %vm387_vm6, %v637_v17 }
 0x175   :  { %1490 = vmatmul.msk.f32.gmra.mxu3 %vm387_vm6, %v637_v17  ;;  %1492 = vmatmul.msk.f32.gmra.mxu1 %vm387_vm6, %v637_v17 }
 0x176   :  { %1056 = vmatpush.msra.mxu2 %v907_v58  ;;  %1109 = vmatpush.msrb.mxu0 %v912_v59 }
 0x177   :  { %1310 = vmatpush.msrb.mxu3 %v1957_v27  ;;  %1356 = vmatpush.msrb.mxu1 %v1959_v28  ;;  %v749_v16 = vpop.f32.mrf.mxu1  ;;  %v693_v22 = vpop.f32.mrf.mxu3 }
 0x17c   :  { %939 = vmatmul.f32.vlgmr.msrb.gmra.mxu2 %v1705_v30  ;;  %998 = vmatmul.f32.vlgmr.msra.gmra.mxu0 %v1705_v30 }
 0x17d   :  { %1181 = vmatpush.msrb.mxu2 %v1973_v4  ;;  %1236 = vmatpush.msra.mxu0 %v1975_v5 }
 0x17f   :  { %1182 = vmatpush.msrb.mxu2 %v1981_v8  ;;  %1237 = vmatpush.msra.mxu0 %v1983_v9  ;;  %v852_v25 = vpop.f32.mrf.mxu1  ;;  %v802_v33 = vpop.f32.mrf.mxu3 }
 0x181   :  { %1183 = vmatpush.msrb.mxu2 %v898_v10  ;;  %1238 = vmatpush.msra.mxu0 %v903_v11 }
 0x183   :  { %1184 = vmatpush.msrb.mxu2 %v897_v18  ;;  %1239 = vmatpush.msra.mxu0 %v902_v19 }
 0x184   :  { %942 = vmatmul.f32.gmra.mxu2 %v1705_v30  ;;  %1001 = vmatmul.f32.gmra.mxu0 %v1705_v30 }
 0x187   :  { %v855_v37 = vpop.f32.mrf.mxu1  ;;  %v805_v55 = vpop.f32.mrf.mxu3 }
 0x18c   :  { %1057 = vmatmul.f32.vlgmr.msra.gmra.mxu2 %v1705_v30  ;;  %1110 = vmatmul.f32.vlgmr.msrb.gmra.mxu0 %v1705_v30 }
 0x18d   :  { %1285 = vmatpush.msra.mxu2 %v910_v45  ;;  %1331 = vmatpush.msrb.mxu0 %v915_v46 }
 0x18f   :  { %1286 = vmatpush.msra.mxu2 %v909_v50  ;;  %1332 = vmatpush.msrb.mxu0 %v914_v51 }
 0x191   :  { %1287 = vmatpush.msra.mxu2 %v908_v53  ;;  %1333 = vmatpush.msrb.mxu0 %v913_v54  ;;  %v2041_v54 = vld [vmem:[%s2122_s8 + $0x1] ss:$0 sm:$0xff] }
 0x193   :  { %1288 = vmatpush.msra.mxu2 %v907_v58  ;;  %1334 = vmatpush.msrb.mxu0 %v912_v59 }
 0x194   :  { %1060 = vmatmul.f32.gmra.mxu2 %v1705_v30  ;;  %1113 = vmatmul.f32.gmra.mxu0 %v1705_v30 }
 0x1d9   :  { %v723_v20 = vpop.f32.mrf.mxu0 }
 0x1da   :  { %v747_v23 = vadd.f32 %v746_v14, %v723_v20  ;;  %v1022_v62 = vpop.f32.mrf.mxu1 }
 0x1dc   :  { %v752_v27 = vadd.f32 %v1894_v41, %v747_v23 }
 0x1de   :  { %v754_v29 = vmul.f32 0.5, %v752_v27 }
 0x1df   :  { %v661_v24 = vpop.f32.mrf.mxu2 }
 0x1e0   :  { %v691_v21 = vadd.f32 %v690_v15, %v661_v24  ;;  %1548 = vtanh.f32 %v754_v29  ;;  %v963_v10 = vpop.f32.mrf.mxu3 }
 0x1e1   :  { %v726_v26 = vpop.f32.mrf.mxu0 }
 0x1e2   :  { %v696_v28 = vadd.f32 %v1899_v44, %v691_v21  ;;  %v750_v31 = vadd.f32 %v749_v16, %v726_v26 }
 0x1e4   :  { %v698_v35 = vmul.f32 0.5, %v696_v28  ;;  %v753_v36 = vadd.f32 %v1894_v41, %v750_v31 }
 0x1e6   :  { %1550 = vtanh.f32 %v698_v35  ;;  %v755_v40 = vmul.f32 0.5, %v753_v36  ;;  %v1549_v48 = vpop.eup %1548 }
 0x1e7   :  { %v664_v34 = vpop.f32.mrf.mxu2  ;;  %v758_v41 = vadd.f32 1.0, %v1549_v48 }
 0x1e8   :  { %v694_v30 = vadd.f32 %v693_v22, %v664_v34  ;;  %1552 = vtanh.f32 %v755_v40  ;;  %v966_v24 = vpop.f32.mrf.mxu3 }
 0x1e9   :  { %v829_v32 = vpop.f32.mrf.mxu0  ;;  %v760_v2 = vmul.f32 0.5, %v758_v41 }
 0x1ea   :  { %v697_v38 = vadd.f32 %v1899_v44, %v694_v30  ;;  %v853_v39 = vadd.f32 %v852_v25, %v829_v32 }
 0x1eb   :  { %v868_v18 = vmul.f32 %v760_v2, %v1967_v49  ;;  %v2046_v49 = vld [vmem:[%s2122_s8] ss:$0 sm:$0xff] }
 0x1ec   :  { %v699_v42 = vmul.f32 0.5, %v697_v38  ;;  %v858_v43 = vadd.f32 %v1932_v3, %v853_v39  ;;  %v1551_v57 = vpop.eup %1550 }
 0x1ed   :  { %v702_v63 = vadd.f32 1.0, %v1551_v57 }
 0x1ee   :  { %1554 = vtanh.f32 %v699_v42  ;;  %v860_v44 = vmul.f32 0.5, %v858_v43  ;;  %v1553_v5 = vpop.eup %1552  ;;  %v2058_v42 = vld [vmem:[%s2122_s8 + $0x3] ss:$0 sm:$0xff] }
 0x1ef   :  { %v779_v47 = vpop.f32.mrf.mxu2  ;;  %v704_v9 = vmul.f32 0.5, %v702_v63  ;;  %v759_v19 = vadd.f32 1.0, %v1553_v5 }
 0x1f0   :  { %v803_v52 = vadd.f32 %v802_v33, %v779_v47  ;;  %v1081_v48 = vpop.f32.mrf.mxu3 }
 0x1f1   :  { %v832_v56 = vpop.f32.mrf.mxu0  ;;  %v761_v58 = vmul.f32 0.5, %v759_v19 }
 0x1f2   :  { %v808_v60 = vadd.f32 %v1937_v6, %v803_v52  ;;  %v856_v61 = vadd.f32 %v855_v37, %v832_v56 }
 0x1f3   :  { %v869_v23 = vmul.f32 %v761_v58, %v1970_v1 }
 0x1f4   :  { %1556 = vtanh.f32 %v808_v60  ;;  %v859_v0 = vadd.f32 %v1932_v3, %v856_v61  ;;  %v1555_v8 = vpop.eup %1554  ;;  %v1025_v3 = vpop.f32.mrf.mxu1 }
 0x1f5   :  { %1558 = vtanh.f32 %v860_v44  ;;  %v703_v50 = vadd.f32 1.0, %v1555_v8 }
 0x1f6   :  { %v861_v13 = vmul.f32 0.5, %v859_v0 }
 0x1f7   :  { %v782_v4 = vpop.f32.mrf.mxu2  ;;  %v705_v15 = vmul.f32 0.5, %v703_v50 }
 0x1f8   :  { %v806_v7 = vadd.f32 %v805_v55, %v782_v4  ;;  %v2063_v55 = vld [vmem:[%s2122_s8 + $0x2] ss:$0 sm:$0xff] }
 0x1f9   :  { %v999_v11 = vpop.f32.mrf.mxu0 }
 0x1fa   :  { %v1557_v12 = vpop.eup %1556  ;;  %v809_v17 = vadd.f32 %v1937_v6, %v806_v7  ;;  %v1023_v53 = vadd.f32 %v1022_v62, %v999_v11 }
 0x1fb   :  { %v870_v45 = vmul.f32 %v1557_v12, %v704_v9  ;;  %v1559_v46 = vpop.eup %1558 }
 0x1fc   :  { %1560 = vtanh.f32 %v809_v17  ;;  %v864_v6 = vadd.f32 1.0, %v1559_v46  ;;  %v1031_v22 = vadd.f32 %v2041_v54, %v1023_v53  ;;  %v1134_v35 = vpop.f32.mrf.mxu1 }
 0x1fd   :  { %v872_v51 = vadd.f32 %v870_v45, %v868_v18  ;;  %1562 = vtanh.f32 %v861_v13 }
 0x1fe   :  { %v866_v26 = vmul.f32 0.5, %v864_v6  ;;  %v1033_v31 = vmul.f32 0.5, %v1031_v22 }
 0x1ff   :  { %1564 = vtanh.f32 %v872_v51  ;;  %v940_v59 = vpop.f32.mrf.mxu2 }
 0x200   :  { %v964_v14 = vadd.f32 %v963_v10, %v940_v59  ;;  %v1084_v10 = vpop.f32.mrf.mxu3 }
 0x201   :  { %v1002_v16 = vpop.f32.mrf.mxu0 }
 0x202   :  { %v1561_v20 = vpop.eup %1560  ;;  %v972_v27 = vadd.f32 %v2046_v49, %v964_v14  ;;  %v1026_v33 = vadd.f32 %v1025_v3, %v1002_v16 }
 0x203   :  { %v871_v21 = vmul.f32 %v1561_v20, %v705_v15  ;;  %v1563_v25 = vpop.eup %1562 }
 0x204   :  { %v865_v32 = vadd.f32 1.0, %v1563_v25  ;;  %v974_v36 = vmul.f32 0.5, %v972_v27  ;;  %v1032_v38 = vadd.f32 %v2041_v54, %v1026_v33  ;;  %v1137_v44 = vpop.f32.mrf.mxu1 }
 0x205   :  { %v1565_v28 = vpop.eup %1564  ;;  %v873_v29 = vadd.f32 %v871_v21, %v869_v23 }
 0x206   :  { %v876_v34 = vmul.f32 %v1565_v28, %v866_v26  ;;  %v867_v43 = vmul.f32 0.5, %v865_v32  ;;  %v1034_v52 = vmul.f32 0.5, %v1032_v38 }
 0x207   :  { %1566 = vtanh.f32 %v873_v29  ;;  %v943_v30 = vpop.f32.mrf.mxu2 }
 0x208   :  { %v967_v37 = vadd.f32 %v966_v24, %v943_v30  ;;  %1495 = vmatmul.msk.f32.vlgmr.msra.gmra.mxu3 %vm387_vm6, %v876_v34  ;;  %1499 = vmatmul.msk.f32.vlgmr.msra.gmra.mxu1 %vm387_vm6, %v876_v34  ;;  %1568 = vtanh.f32 %v1033_v31 }
 0x209   :  { %v1111_v1 = vpop.f32.mrf.mxu0  ;;  %1570 = vtanh.f32 %v974_v36 }
 0x20a   :  { %v973_v39 = vadd.f32 %v2046_v49, %v967_v37  ;;  %v1135_v40 = vadd.f32 %v1134_v35, %v1111_v1  ;;  %1572 = vtanh.f32 %v1034_v52 }
 0x20c   :  { %v975_v57 = vmul.f32 0.5, %v973_v39  ;;  %v1143_v60 = vadd.f32 %v2058_v42, %v1135_v40 }
 0x20d   :  { %v1567_v47 = vpop.eup %1566 }
 0x20e   :  { %v877_v56 = vmul.f32 %v1567_v47, %v867_v43  ;;  %v1569_v41 = vpop.eup %1568  ;;  %1574 = vtanh.f32 %v975_v57  ;;  %v1145_v7 = vmul.f32 0.5, %v1143_v60  ;;  %v1382_v47 = vld [vmem:[%s2123_s9 + $0x18] sm:$0xff]  ;;  %v1380_v57 = vld [vmem:[%s2123_s9 + $0x8] sm:$0xff] }
 0x20f   :  { %v1058_v61 = vpop.f32.mrf.mxu2  ;;  %v1571_v0 = vpop.eup %1570  ;;  %v1037_v5 = vadd.f32 1.0, %v1569_v41 }
 0x210   :  { %v1082_v62 = vadd.f32 %v1081_v48, %v1058_v61  ;;  %1496 = vmatmul.msk.f32.gmra.mxu3 %vm387_vm6, %v877_v56  ;;  %1500 = vmatmul.msk.f32.gmra.mxu1 %vm387_vm6, %v877_v56  ;;  %v978_v8 = vadd.f32 1.0, %v1571_v0  ;;  %v1573_v13 = vpop.eup %1572  ;;  %v1381_v48 = vld [vmem:[%s2123_s9 + $0x10] sm:$0xff]  ;;  %v1379_v61 = vld [vmem:[%s2123_s9] sm:$0xff] }
 0x211   :  { %v1114_v63 = vpop.f32.mrf.mxu0  ;;  %v1039_v11 = vmul.f32 0.5, %v1037_v5  ;;  %v1038_v51 = vadd.f32 1.0, %v1573_v13 }
 0x212   :  { %v1090_v2 = vadd.f32 %v2063_v55, %v1082_v62  ;;  %v1138_v4 = vadd.f32 %v1137_v44, %v1114_v63  ;;  %v980_v19 = vmul.f32 0.5, %v978_v8 }
 0x213   :  { %v1153_v50 = vmul.f32 0.0, %v1039_v11  ;;  %v1040_v14 = vmul.f32 0.5, %v1038_v51 }
 0x214   :  { %1576 = vtanh.f32 %v1090_v2  ;;  %v1144_v9 = vadd.f32 %v2058_v42, %v1138_v4  ;;  %v1575_v18 = vpop.eup %1574 }
 0x215   :  { %1578 = vtanh.f32 %v1145_v7  ;;  %v979_v59 = vadd.f32 1.0, %v1575_v18  ;;  %v1154_v22 = vmul.f32 0.0, %v1040_v14  ;;  %v1527_v14 = vld [vmem:[%s2124_s10] ss:$0 sm:$0xff] }
 0x216   :  { %v1146_v46 = vmul.f32 0.5, %v1144_v9 }
 0x217   :  { %v1061_v12 = vpop.f32.mrf.mxu2  ;;  %v981_v16 = vmul.f32 0.5, %v979_v59 }
 0x218   :  { %v1085_v17 = vadd.f32 %v1084_v10, %v1061_v12  ;;  %1503 = vmatmul.msk.f32.vlgmr.msrb.gmra.mxu3 %vm387_vm6, %v876_v34  ;;  %1507 = vmatmul.msk.f32.vlgmr.msrb.gmra.mxu1 %vm387_vm6, %v876_v34 }
 0x21a   :  { %v1577_v45 = vpop.eup %1576  ;;  %v1091_v3 = vadd.f32 %v2063_v55, %v1085_v17 }
 0x21b   :  { %v1155_v53 = vmul.f32 %v1577_v45, %v980_v19  ;;  %v1579_v58 = vpop.eup %1578 }
 0x21c   :  { %1580 = vtanh.f32 %v1091_v3  ;;  %v1149_v15 = vadd.f32 1.0, %v1579_v58 }
 0x21d   :  { %v1157_v6 = vadd.f32 %v1155_v53, %v1153_v50  ;;  %1582 = vtanh.f32 %v1146_v46 }
 0x21e   :  { %v1151_v21 = vmul.f32 0.5, %v1149_v15 }
 0x21f   :  { %1584 = vtanh.f32 %v1157_v6 }
 0x220   :  { %1504 = vmatmul.msk.f32.gmra.mxu3 %vm387_vm6, %v877_v56  ;;  %1508 = vmatmul.msk.f32.gmra.mxu1 %vm387_vm6, %v877_v56 }
 0x222   :  { %v1581_v20 = vpop.eup %1580 }
 0x223   :  { %v1156_v23 = vmul.f32 %v1581_v20, %v981_v16  ;;  %v1583_v24 = vpop.eup %1582 }
 0x224   :  { %v1150_v28 = vadd.f32 1.0, %v1583_v24 }
 0x225   :  { %v1585_v25 = vpop.eup %1584  ;;  %v1158_v26 = vadd.f32 %v1156_v23, %v1154_v22 }
 0x226   :  { %v1161_v27 = vmul.f32 %v1585_v25, %v1151_v21  ;;  %v1152_v29 = vmul.f32 0.5, %v1150_v28 }
 0x227   :  { %1586 = vtanh.f32 %v1158_v26 }
 0x228   :  { %1493 = vmatmul.msk.f32.vlgmr.msrb.gmra.mxu2 %vm387_vm6, %v1161_v27  ;;  %1497 = vmatmul.msk.f32.vlgmr.msra.gmra.mxu0 %vm387_vm6, %v1161_v27 }
 0x229   :  { %1402 = vmatpush.msrb.mxu2 %v1382_v47 }
 0x22b   :  { %1403 = vmatpush.msrb.mxu2 %v1381_v48 }
 0x22d   :  { %v1587_v31 = vpop.eup %1586  ;;  %1404 = vmatpush.msrb.mxu2 %v1380_v57 }
 0x22e   :  { %v2077_v33 = vmul.f32 %v1587_v31, %v1152_v29 }
 0x22f   :  { %1405 = vmatpush.msrb.mxu2 %v1379_v61 }
 0x230   :  { %1494 = vmatmul.msk.f32.gmra.mxu2 %vm387_vm6, %v2077_v33  ;;  %1498 = vmatmul.msk.f32.gmra.mxu0 %vm387_vm6, %v2077_v33  ;;  %v1373_v59 = vrot.slane %v2077_v33, 5 }
 0x238   :  { %1501 = vmatmul.msk.f32.vlgmr.msra.gmra.mxu2 %vm387_vm6, %v1161_v27  ;;  %1505 = vmatmul.msk.f32.vlgmr.msrb.gmra.mxu0 %vm387_vm6, %v1161_v27 }
 0x240   :  { %1502 = vmatmul.msk.f32.gmra.mxu2 %vm387_vm6, %v2077_v33  ;;  %1506 = vmatmul.msk.f32.gmra.mxu0 %vm387_vm6, %v2077_v33 }
 0x285   :  { %v1263_v34 = vpop.f32.mrf.mxu1 }
 0x28b   :  { %v1214_v35 = vpop.f32.mrf.mxu3 }
 0x28d   :  { %v1265_v30 = vpop.f32.mrf.mxu1 }
 0x293   :  { %v1216_v32 = vpop.f32.mrf.mxu3 }
 0x295   :  { %v1358_v36 = vpop.f32.mrf.mxu1 }
 0x29b   :  { %v1312_v37 = vpop.f32.mrf.mxu3 }
 0x29d   :  { %v1360_v2 = vpop.f32.mrf.mxu1 }
 0x2a3   :  { %v1314_v5 = vpop.f32.mrf.mxu3 }
 0x2a5   :  { %v1241_v1 = vpop.f32.mrf.mxu0 }
 0x2ab   :  { %v1186_v38 = vpop.f32.mrf.mxu2 }
 0x2ad   :  { %v1243_v39 = vpop.f32.mrf.mxu0 }
 0x2ae   :  { %v1266_v40 = vadd.f32 %v1265_v30, %v1243_v39 }
 0x2b0   :  { %v1268_v60 = vadd.f32 %v2041_v54, %v1266_v40 }
 0x2b2   :  { %v1269_v62 = vmul.f32 0.5, %v1268_v60 }
 0x2b3   :  { %v1188_v43 = vpop.f32.mrf.mxu2 }
 0x2b4   :  { %v1217_v52 = vadd.f32 %v1216_v32, %v1188_v43  ;;  %1588 = vtanh.f32 %v1269_v62 }
 0x2b5   :  { %v1336_v56 = vpop.f32.mrf.mxu0 }
 0x2b6   :  { %v1219_v41 = vadd.f32 %v2046_v49, %v1217_v52 }
 0x2b8   :  { %v1220_v63 = vmul.f32 0.5, %v1219_v41 }
 0x2ba   :  { %1590 = vtanh.f32 %v1220_v63  ;;  %v1589_v8 = vpop.eup %1588 }
 0x2bb   :  { %v1290_v44 = vpop.f32.mrf.mxu2  ;;  %v1271_v49 = vadd.f32 1.0, %v1589_v8 }
 0x2bd   :  { %v1338_v0 = vpop.f32.mrf.mxu0  ;;  %v1272_v17 = vmul.f32 0.5, %v1271_v49 }
 0x2be   :  { %v1361_v4 = vadd.f32 %v1360_v2, %v1338_v0 }
 0x2bf   :  { %v1368_v45 = vmul.f32 %v1272_v17, %v1158_v26 }
 0x2c0   :  { %v1363_v54 = vadd.f32 %v2058_v42, %v1361_v4  ;;  %v1591_v10 = vpop.eup %1590 }
 0x2c1   :  { %v1222_v13 = vadd.f32 1.0, %v1591_v10 }
 0x2c2   :  { %v1364_v12 = vmul.f32 0.5, %v1363_v54 }
 0x2c3   :  { %v1292_v7 = vpop.f32.mrf.mxu2  ;;  %v1223_v18 = vmul.f32 0.5, %v1222_v13 }
 0x2c4   :  { %v1315_v9 = vadd.f32 %v1314_v5, %v1292_v7 }
 0x2c6   :  { %v1317_v11 = vadd.f32 %v2063_v55, %v1315_v9 }
 0x2c8   :  { %1592 = vtanh.f32 %v1317_v11 }
 0x2c9   :  { %1594 = vtanh.f32 %v1364_v12 }
 0x2ce   :  { %v1593_v19 = vpop.eup %1592 }
 0x2cf   :  { %v1369_v46 = vmul.f32 %v1593_v19, %v1223_v18  ;;  %v1595_v3 = vpop.eup %1594 }
 0x2d0   :  { %v1366_v42 = vadd.f32 1.0, %v1595_v3 }
 0x2d1   :  { %v1370_v50 = vadd.f32 %v1369_v46, %v1368_v45 }
 0x2d2   :  { %v1367_v51 = vmul.f32 0.5, %v1366_v42 }
 0x2d3   :  { %1596 = vtanh.f32 %v1370_v50 }
 0x2d9   :  { %v1597_v53 = vpop.eup %1596 }
 0x2da   :  { %v1372_v58 = vmul.f32 %v1597_v53, %v1367_v51 }
 0x2dc   :  { %v1376_v55 = vrot.slane %v1372_v58, 4 }
 0x2de   :  { %v1378_v6 = vsel %vm207_vm4, %v1373_v59, %v1376_v55 }
 0x2df   :  { %1509 = vmatmul.msk.f32.vlgmr.msrb.gmra.mxu2 %vm387_vm6, %v1378_v6 }
 0x362   :  { %v1407_v15 = vpop.f32.mrf.mxu2 }
 0x363   :  { %v1408_v16 = vadd.f32 %v1527_v14, %v1407_v15 }
 0x365   :  { %1411 = vst.msk [vmem:[#allocation8] sm:$0x3] %vm1410_vm7, %v1408_v16 }
 0x366   :  { %1422 = dma.vmem_to_hbm [thread:$0]  %s1418_s6, 32, %s1420_s3, [#allocation4]  }
 0x367   :  { %1698 = dma.done.wait [#allocation4], 32  }
 0x368   :  { %1699 = vsyncadd [#allocation4], 4294967264 }
 0x369   :  { %1427 = vsyncpa [#allocation3], 1 }
 0x36a   :  { %1428 = vsyncpa [#allocation6], 1 }
 0x36b   :  { %1429 = vsyncpa [#allocation4], 1 }

</bundles_post_ra>
